<compile_context>
chip_gen: v6e
topology: v6e:2x2x1
jax: 0.10.0
libtpu: 0.0.40
codegen_flags: <defaults>
</compile_context>

<pallas_src>
import math

import jax
import jax.numpy as jnp
from jax.experimental import pallas as pl
from jax.experimental.pallas import tpu as pltpu

# ----------------------------- configuration --------------------------------
PAD_TOKEN = 0
SOS_TOKEN = 1

SEQ = 8          # sequence length
BATCH = 2        # batch size
VOCAB = 64       # vocab size
D_MODEL = 32     # model width
NHEAD = 4        # attention heads
HEAD_DIM = D_MODEL // NHEAD
DIM_FF = 64      # feed-forward width
NUM_LAYERS = 2
LN_EPS = 1e-5
NEG_INF = -1e30  # finite; exp(x + NEG_INF) underflows to exactly 0.0 in f32

BS = BATCH * SEQ
EMB_ROWS = VOCAB + SEQ   # [word_emb ; pos_emb] stacked table


# ------------------------------ fused Pallas kernel ---------------------------
def fused_forward_kernel(
    ids_ref,      # (B*S, 2)   int32  col0 = token id, col1 = VOCAB + position
    bias_ref,     # (B, S, S)  f32    additive attention bias (causal + key padding)
    emb_ref,      # (V+S, D)   bf16   [word_emb ; pos_emb]
    w_qkv_ref,    # (L, D, 128) bf16  [Wq/sqrt(dh) | Wk | Wv | 0-pad]  (lane-dense)
    w_o_ref,      # (L, D, D)  bf16
    w_ff1_ref,    # (L, D, FF) bf16
    w_ff2_ref,    # (L, FF, D) bf16
    vec_ref,      # (L, 8, 128) f32   rows: [b_qkv | b_o | b_ff1 | ln1_g | ln1_b | b_ff2 | ln2_g | ln2_b]
    w_out_ref,    # (D, V)     bf16
    out_ref,      # (S, B*V)   f32    lane-dense logits
    attn_scratch, # (B*S, D)   f32    VMEM scratch: per-head outputs assembled here
):
    f32 = jnp.float32
    bf16 = jnp.bfloat16

    # ---- fused embedding gather: two-hot @ [word_emb ; pos_emb] (one MXU push) ----
    ids = ids_ref[...]                                              # (B*S, 2) int32
    tok = ids[:, 0:1]                                               # (B*S, 1)
    posl = ids[:, 1:2]                                              # (B*S, 1)
    lane = jax.lax.broadcasted_iota(jnp.int32, (BS, EMB_ROWS), 1)   # (B*S, V+S)
    hot = jnp.where(jnp.logical_or(lane == tok, lane == posl), 1.0, 0.0).astype(bf16)
    h = jnp.dot(hot, emb_ref[...], preferred_element_type=f32)      # (B*S, D) f32

    # Per-batch additive attention bias, hoisted out of the layer/head loops.
    # NOTE: a fully padded key row would yield a uniform softmax here instead of
    # PyTorch's NaN; test data contains no PAD tokens.
    bias_b = [bias_ref[b] for b in range(BATCH)]                    # each (S, S) f32

    w_out = w_out_ref[...]                                          # (D, V) bf16

    for l in range(NUM_LAYERS):
        w_qkv = w_qkv_ref[l]                       # (D, 128) bf16, lane-dense
        w_o = w_o_ref[l]                           # (D, D)  bf16
        vecs = vec_ref[l]                          # (8, 128) f32
        b_qkv = vecs[0:1, :]                       # (1, 128) (q-part pre-scaled)
        b_o = vecs[1:2, :D_MODEL]                  # (1, D)
        b_ff1 = vecs[2:3, :DIM_FF]                 # (1, FF)
        ln1_g = vecs[3:4, :D_MODEL]
        ln1_b = vecs[4:5, :D_MODEL]
        b_ff2 = vecs[5:6, :D_MODEL]
        ln2_g = vecs[6:7, :D_MODEL]
        ln2_b = vecs[7:8, :D_MODEL]

        # fused QKV projection for the whole (B*S) slab, full 128 output lanes
        qkv = jnp.dot(h.astype(bf16), w_qkv,
                      preferred_element_type=f32) + b_qkv           # (B*S, 128)

        # scaled dot-product attention, per (batch, head); bf16 MXU operands,
        # head outputs written straight into the VMEM scratch (no concatenates).
        for b in range(BATCH):
            r0, r1 = b * SEQ, (b + 1) * SEQ
            for hd in range(NHEAD):
                c0 = hd * HEAD_DIM
                qh = qkv[r0:r1, c0:c0 + HEAD_DIM].astype(bf16)                  # (S, dh)
                kh = qkv[r0:r1, D_MODEL + c0:D_MODEL + c0 + HEAD_DIM].astype(bf16)
                vh = qkv[r0:r1, 2 * D_MODEL + c0:2 * D_MODEL + c0 + HEAD_DIM].astype(bf16)
                sc = jax.lax.dot_general(                                        # q @ k^T (scale folded in Wq)
                    qh, kh, (((1,), (1,)), ((), ())),
                    preferred_element_type=f32)
                # no max-subtraction: masked entries underflow to 0, unmasked scores are small
                p = jnp.exp(sc + bias_b[b])
                p = p * pl.reciprocal(p.sum(axis=-1, keepdims=True), approx=True)
                attn_scratch[r0:r1, c0:c0 + HEAD_DIM] = jnp.dot(
                    p.astype(bf16), vh, preferred_element_type=f32)              # (S, dh)

        attn = jnp.dot(attn_scratch[...].astype(bf16), w_o,
                       preferred_element_type=f32) + b_o             # (B*S, D)

        # residual + LayerNorm 1 (post-LN) -- f32 elementwise math
        h1 = h + attn
        mu1 = jnp.mean(h1, axis=-1, keepdims=True)
        var1 = jnp.mean((h1 - mu1) ** 2, axis=-1, keepdims=True)
        h1 = (h1 - mu1) * jax.lax.rsqrt(var1 + LN_EPS) * ln1_g + ln1_b

        # feed-forward (use_gelu=False -> ReLU)
        ff = jnp.dot(h1.astype(bf16), w_ff1_ref[l],
                     preferred_element_type=f32) + b_ff1             # (B*S, FF)
        ff = jnp.maximum(ff, 0.0)
        ff = jnp.dot(ff.astype(bf16), w_ff2_ref[l],
                     preferred_element_type=f32) + b_ff2             # (B*S, D)

        # residual + LayerNorm 2
        h2 = h1 + ff
        mu2 = jnp.mean(h2, axis=-1, keepdims=True)
        var2 = jnp.mean((h2 - mu2) ** 2, axis=-1, keepdims=True)
        h = (h2 - mu2) * jax.lax.rsqrt(var2 + LN_EPS) * ln2_g + ln2_b

    # output projection (hidden2emb = Identity, out_proj bias-free), stored lane-dense
    # per batch: out[s, b*V + v] = logits[b*S + s, v]   (no concat repack)
    hb = h.astype(bf16)
    for b in range(BATCH):
        out_ref[:, b * VOCAB:(b + 1) * VOCAB] = jnp.dot(
            hb[b * SEQ:(b + 1) * SEQ, :], w_out,
            preferred_element_type=f32).astype(out_ref.dtype)


# ------------------------------ wrapper ---------------------------------------
def transformer_clm_forward(params, src, keyword_ids=None):
    """src: (S, B) int32 token ids. Returns (logits,) with logits (S, B, V)."""
    del keyword_ids  # keyword_approaches = () -> no khead / ktoken handling

    # input = cat([SOS row, src[:-1]])
    sos = jnp.full((1, BATCH), SOS_TOKEN, dtype=src.dtype)
    inp = jnp.concatenate([sos, src[:-1]], axis=0)                       # (S, B)
    inp_t = inp.T                                                        # (B, S)

    # causal + key-padding folded into ONE additive f32 bias (B, S, S) -- 512 B
    pos = jnp.arange(SEQ)
    causal = jnp.where(pos[None, :] > pos[:, None], NEG_INF, 0.0).astype(jnp.float32)  # (S, S)
    pad = jnp.where(inp_t == PAD_TOKEN, NEG_INF, 0.0).astype(jnp.float32)              # (B, S)
    bias = causal[None, :, :] + pad[:, None, :]                                        # (B, S, S)

    # token id + (VOCAB + position) columns, batch-major rows (row = b*S + s)
    tok = inp_t.reshape(BS, 1).astype(jnp.int32)
    posid = jnp.tile(VOCAB + jnp.arange(SEQ, dtype=jnp.int32), (BATCH,)).reshape(BS, 1)
    ids = jnp.concatenate([tok, posid], axis=1)                          # (B*S, 2) int32

    out = pl.pallas_call(
        fused_forward_kernel,
        out_shape=jax.ShapeDtypeStruct((SEQ, BATCH * VOCAB), jnp.float32),
        scratch_shapes=[pltpu.VMEM((BS, D_MODEL), jnp.float32)],
        compiler_params=pltpu.CompilerParams(vmem_limit_bytes=16 * 1024 * 1024),
    )(
        ids, bias,
        params["emb_table"],
        params["w_qkv"], params["w_o"],
        params["w_ff1"], params["w_ff2"],
        params["vecs"], params["w_out"],
    )
    logits = out.reshape(SEQ, BATCH, VOCAB)                              # (S, B, V)
    return (logits,)


# --------------------------- parameter construction --------------------------
def init_params(key):
    keys = jax.random.split(key, 3 + NUM_LAYERS)

    def nrm(k, shape, scale=0.02):
        return (scale * jax.random.normal(k, shape)).astype(jnp.float32)

    word_emb = nrm(keys[0], (VOCAB, D_MODEL))
    pos_emb = nrm(keys[1], (SEQ, D_MODEL))
    emb_table = jnp.concatenate([word_emb, pos_emb], axis=0).astype(jnp.bfloat16)  # (V+S, D)

    w_out = nrm(keys[2], (D_MODEL, VOCAB)).astype(jnp.bfloat16)  # nn.Linear(d_model, vocab, bias=False)

    inv_sqrt_dh = 1.0 / math.sqrt(HEAD_DIM)   # attention scale folded into Wq (and b_q)
    w_qkv_l, w_o_l, w_ff1_l, w_ff2_l = [], [], [], []
    for i in range(NUM_LAYERS):
        lk = jax.random.split(keys[3 + i], 6)
        wq = nrm(lk[0], (D_MODEL, D_MODEL)) * inv_sqrt_dh
        wk = nrm(lk[1], (D_MODEL, D_MODEL))
        wv = nrm(lk[2], (D_MODEL, D_MODEL))
        wo = nrm(lk[3], (D_MODEL, D_MODEL))
        # [Wq/sqrt(dh) | Wk | Wv | zero-pad] -> lane-dense (D, 128) slab
        w_qkv_l.append(jnp.concatenate(
            [wq, wk, wv, jnp.zeros((D_MODEL, D_MODEL), jnp.float32)], axis=1))
        w_o_l.append(wo)
        w_ff1_l.append(nrm(lk[4], (D_MODEL, DIM_FF)))
        w_ff2_l.append(nrm(lk[5], (DIM_FF, D_MODEL)))

    def pad_lanes(v):
        return jnp.pad(v, (0, 128 - v.shape[0]))

    # packed per-layer f32 vectors (8, 128):
    #   0: [b_q*inv_sqrt_dh | b_k | b_v | 0]   1: [b_o | 0]   2: [b_ff1 | 0]
    #   3: ln1_gamma  4: ln1_beta  5: b_ff2  6: ln2_gamma  7: ln2_beta
    zeros_d = jnp.zeros((D_MODEL,), jnp.float32)
    vec_one = jnp.stack([
        pad_lanes(jnp.concatenate([zeros_d * inv_sqrt_dh, zeros_d, zeros_d])),  # b_qkv
        pad_lanes(zeros_d),                                                     # b_o
        pad_lanes(jnp.zeros((DIM_FF,), jnp.float32)),                           # b_ff1
        pad_lanes(jnp.ones((D_MODEL,), jnp.float32)),                           # ln1 gamma
        pad_lanes(zeros_d),                                                     # ln1 beta
        pad_lanes(zeros_d),                                                     # b_ff2
        pad_lanes(jnp.ones((D_MODEL,), jnp.float32)),                           # ln2 gamma
        pad_lanes(zeros_d),                                                     # ln2 beta
    ])
    vecs = jnp.stack([vec_one] * NUM_LAYERS)                                    # (L, 8, 128)

    return {
        "emb_table": emb_table,
        "w_out": w_out,
        "w_qkv": jnp.stack(w_qkv_l).astype(jnp.bfloat16),    # (L, D, 128)
        "w_o": jnp.stack(w_o_l).astype(jnp.bfloat16),        # (L, D, D)
        "w_ff1": jnp.stack(w_ff1_l).astype(jnp.bfloat16),    # (L, D, FF)
        "w_ff2": jnp.stack(w_ff2_l).astype(jnp.bfloat16),    # (L, FF, D)
        "vecs": vecs,
    }


# ----------------------------------- main ------------------------------------
if __name__ == "__main__":
    key = jax.random.PRNGKey(0)
    k_src, k_kw, k_par = jax.random.split(key, 3)

    # tokens in [5, VOCAB) so no PAD tokens (avoids fully-masked softmax rows,
    # matching the NaN-free training path of the PyTorch model)
    src = jax.random.randint(k_src, (SEQ, BATCH), 5, VOCAB, dtype=jnp.int32)
    keyword_ids = jax.random.randint(k_kw, (BATCH,), 5, VOCAB, dtype=jnp.int32)

    params = init_params(k_par)

    fwd = jax.jit(transformer_clm_forward)
    (logits,) = fwd(params, src, keyword_ids)
    logits = jax.block_until_ready(logits)

    assert logits.shape == (SEQ, BATCH, VOCAB), logits.shape
    assert bool(jnp.all(jnp.isfinite(logits)))
    print("KERNEL_OK")
</pallas_src>

<mosaic_0001>
module attributes {stable_mosaic.version = 11 : i64} {
  func.func @fused_forward_kernel(%arg0: memref<16x2xi32, #tpu.memory_space<vmem>>, %arg1: memref<2x8x8xf32, #tpu.memory_space<vmem>>, %arg2: memref<72x32xbf16, #tpu.memory_space<vmem>>, %arg3: memref<2x32x128xbf16, #tpu.memory_space<vmem>>, %arg4: memref<2x32x32xbf16, #tpu.memory_space<vmem>>, %arg5: memref<2x32x64xbf16, #tpu.memory_space<vmem>>, %arg6: memref<2x64x32xbf16, #tpu.memory_space<vmem>>, %arg7: memref<2x8x128xf32, #tpu.memory_space<vmem>>, %arg8: memref<32x64xbf16, #tpu.memory_space<vmem>>, %arg9: memref<8x128xf32, #tpu.memory_space<vmem>>, %arg10: memref<16x32xf32, #tpu.memory_space<vmem>>) attributes {dimension_semantics = [], scalar_prefetch = 0 : i64, scratch_operands = 1 : i64, tpu.core_type = #tpu.core_type<tc>} {
    %c0 = arith.constant 0 : index
    %c0_0 = arith.constant 0 : index
    %0 = vector.load %arg0[%c0, %c0_0] : memref<16x2xi32, #tpu.memory_space<vmem>>, vector<16x2xi32>
    %1 = vector.extract_strided_slice %0 {offsets = [0, 0], sizes = [16, 1], strides = [1, 1]} : vector<16x2xi32> to vector<16x1xi32>
    %2 = vector.extract_strided_slice %0 {offsets = [0, 1], sizes = [16, 1], strides = [1, 1]} : vector<16x2xi32> to vector<16x1xi32>
    %3 = tpu.iota {dimensions = array<i32: 1>} : vector<16x72xi32>
    %4 = vector.broadcast %1 : vector<16x1xi32> to vector<16x72xi32>
    %5 = arith.cmpi eq, %3, %4 : vector<16x72xi32>
    %6 = vector.broadcast %2 : vector<16x1xi32> to vector<16x72xi32>
    %7 = arith.cmpi eq, %3, %6 : vector<16x72xi32>
    %8 = arith.ori %5, %7 : vector<16x72xi1>
    %cst = arith.constant 1.000000e+00 : f32
    %cst_1 = arith.constant 0.000000e+00 : f32
    %9 = vector.broadcast %cst : f32 to vector<16x72xf32>
    %10 = vector.broadcast %cst_1 : f32 to vector<16x72xf32>
    %11 = arith.select %8, %9, %10 : vector<16x72xi1>, vector<16x72xf32>
    %12 = arith.truncf %11 : vector<16x72xf32> to vector<16x72xbf16>
    %c0_2 = arith.constant 0 : index
    %c0_3 = arith.constant 0 : index
    %13 = vector.load %arg2[%c0_2, %c0_3] : memref<72x32xbf16, #tpu.memory_space<vmem>>, vector<72x32xbf16>
    %cst_4 = arith.constant dense<0.000000e+00> : vector<16x32xf32>
    %14 = tpu.matmul %12, %13, %cst_4 {dimension_numbers = #tpu.dot_dimension_numbers<[1], [0], [0], [1], [0, 0, 1, 1], [], []>} : vector<16x72xbf16>, vector<72x32xbf16>, vector<16x32xf32> -> vector<16x32xf32>
    %c0_5 = arith.constant 0 : index
    %c0_6 = arith.constant 0 : index
    %c0_7 = arith.constant 0 : index
    %15 = vector.load %arg1[%c0_5, %c0_6, %c0_7] : memref<2x8x8xf32, #tpu.memory_space<vmem>>, vector<1x8x8xf32>
    %16 = vector.shape_cast %15 : vector<1x8x8xf32> to vector<8x8xf32>
    %c1 = arith.constant 1 : index
    %c0_8 = arith.constant 0 : index
    %c0_9 = arith.constant 0 : index
    %17 = vector.load %arg1[%c1, %c0_8, %c0_9] : memref<2x8x8xf32, #tpu.memory_space<vmem>>, vector<1x8x8xf32>
    %18 = vector.shape_cast %17 : vector<1x8x8xf32> to vector<8x8xf32>
    %c0_10 = arith.constant 0 : index
    %c0_11 = arith.constant 0 : index
    %19 = vector.load %arg8[%c0_10, %c0_11] : memref<32x64xbf16, #tpu.memory_space<vmem>>, vector<32x64xbf16>
    %c0_12 = arith.constant 0 : index
    %c0_13 = arith.constant 0 : index
    %c0_14 = arith.constant 0 : index
    %20 = vector.load %arg3[%c0_12, %c0_13, %c0_14] : memref<2x32x128xbf16, #tpu.memory_space<vmem>>, vector<1x32x128xbf16>
    %21 = vector.shape_cast %20 : vector<1x32x128xbf16> to vector<32x128xbf16>
    %c0_15 = arith.constant 0 : index
    %c0_16 = arith.constant 0 : index
    %c0_17 = arith.constant 0 : index
    %22 = vector.load %arg4[%c0_15, %c0_16, %c0_17] : memref<2x32x32xbf16, #tpu.memory_space<vmem>>, vector<1x32x32xbf16>
    %23 = vector.shape_cast %22 : vector<1x32x32xbf16> to vector<32x32xbf16>
    %c0_18 = arith.constant 0 : index
    %c0_19 = arith.constant 0 : index
    %c0_20 = arith.constant 0 : index
    %24 = vector.load %arg7[%c0_18, %c0_19, %c0_20] : memref<2x8x128xf32, #tpu.memory_space<vmem>>, vector<1x8x128xf32>
    %25 = vector.shape_cast %24 : vector<1x8x128xf32> to vector<8x128xf32>
    %26 = vector.extract_strided_slice %25 {offsets = [0, 0], sizes = [1, 128], strides = [1, 1]} : vector<8x128xf32> to vector<1x128xf32>
    %27 = vector.extract_strided_slice %25 {offsets = [1, 0], sizes = [1, 32], strides = [1, 1]} : vector<8x128xf32> to vector<1x32xf32>
    %28 = vector.extract_strided_slice %25 {offsets = [2, 0], sizes = [1, 64], strides = [1, 1]} : vector<8x128xf32> to vector<1x64xf32>
    %29 = vector.extract_strided_slice %25 {offsets = [3, 0], sizes = [1, 32], strides = [1, 1]} : vector<8x128xf32> to vector<1x32xf32>
    %30 = vector.extract_strided_slice %25 {offsets = [4, 0], sizes = [1, 32], strides = [1, 1]} : vector<8x128xf32> to vector<1x32xf32>
    %31 = vector.extract_strided_slice %25 {offsets = [5, 0], sizes = [1, 32], strides = [1, 1]} : vector<8x128xf32> to vector<1x32xf32>
    %32 = vector.extract_strided_slice %25 {offsets = [6, 0], sizes = [1, 32], strides = [1, 1]} : vector<8x128xf32> to vector<1x32xf32>
    %33 = vector.extract_strided_slice %25 {offsets = [7, 0], sizes = [1, 32], strides = [1, 1]} : vector<8x128xf32> to vector<1x32xf32>
    %34 = arith.truncf %14 : vector<16x32xf32> to vector<16x32xbf16>
    %cst_21 = arith.constant dense<0.000000e+00> : vector<16x128xf32>
    %35 = tpu.matmul %34, %21, %cst_21 {dimension_numbers = #tpu.dot_dimension_numbers<[1], [0], [0], [1], [0, 0, 1, 1], [], []>} : vector<16x32xbf16>, vector<32x128xbf16>, vector<16x128xf32> -> vector<16x128xf32>
    %36 = vector.broadcast %26 : vector<1x128xf32> to vector<16x128xf32>
    %37 = arith.addf %35, %36 : vector<16x128xf32>
    %38 = vector.extract_strided_slice %37 {offsets = [0, 0], sizes = [8, 8], strides = [1, 1]} : vector<16x128xf32> to vector<8x8xf32>
    %39 = arith.truncf %38 : vector<8x8xf32> to vector<8x8xbf16>
    %40 = vector.extract_strided_slice %37 {offsets = [0, 32], sizes = [8, 8], strides = [1, 1]} : vector<16x128xf32> to vector<8x8xf32>
    %41 = arith.truncf %40 : vector<8x8xf32> to vector<8x8xbf16>
    %42 = vector.extract_strided_slice %37 {offsets = [0, 64], sizes = [8, 8], strides = [1, 1]} : vector<16x128xf32> to vector<8x8xf32>
    %43 = arith.truncf %42 : vector<8x8xf32> to vector<8x8xbf16>
    %cst_22 = arith.constant dense<0.000000e+00> : vector<8x8xf32>
    %44 = tpu.matmul %39, %41, %cst_22 {dimension_numbers = #tpu.dot_dimension_numbers<[1], [1], [0], [0], [0, 0, 1, 0], [], []>} : vector<8x8xbf16>, vector<8x8xbf16>, vector<8x8xf32> -> vector<8x8xf32>
    %45 = arith.addf %44, %16 : vector<8x8xf32>
    %46 = math.exp %45 : vector<8x8xf32>
    %cst_23 = arith.constant dense<0.000000e+00> : vector<8xf32>
    %47 = vector.multi_reduction <add>, %46, %cst_23 [1] : vector<8x8xf32> to vector<8xf32>
    %48 = vector.shape_cast %47 : vector<8xf32> to vector<8x1xf32>
    %49 = tpu.reciprocal %48 {approx = true} : vector<8x1xf32> -> vector<8x1xf32>
    %50 = vector.broadcast %49 : vector<8x1xf32> to vector<8x8xf32>
    %51 = arith.mulf %46, %50 : vector<8x8xf32>
    %52 = arith.truncf %51 : vector<8x8xf32> to vector<8x8xbf16>
    %cst_24 = arith.constant dense<0.000000e+00> : vector<8x8xf32>
    %53 = tpu.matmul %52, %43, %cst_24 {dimension_numbers = #tpu.dot_dimension_numbers<[1], [0], [0], [1], [0, 0, 1, 1], [], []>} : vector<8x8xbf16>, vector<8x8xbf16>, vector<8x8xf32> -> vector<8x8xf32>
    %c0_25 = arith.constant 0 : index
    %c0_26 = arith.constant 0 : index
    %54 = vector.load %arg10[%c0_25, %c0_26] : memref<16x32xf32, #tpu.memory_space<vmem>>, vector<8x8xf32>
    tpu.vector_store %arg10[%c0_25, %c0_26], %53 {strides = array<i32>} : memref<16x32xf32, #tpu.memory_space<vmem>>, vector<8x8xf32>,
    %55 = vector.extract_strided_slice %37 {offsets = [0, 8], sizes = [8, 8], strides = [1, 1]} : vector<16x128xf32> to vector<8x8xf32>
    %56 = arith.truncf %55 : vector<8x8xf32> to vector<8x8xbf16>
    %57 = vector.extract_strided_slice %37 {offsets = [0, 40], sizes = [8, 8], strides = [1, 1]} : vector<16x128xf32> to vector<8x8xf32>
    %58 = arith.truncf %57 : vector<8x8xf32> to vector<8x8xbf16>
    %59 = vector.extract_strided_slice %37 {offsets = [0, 72], sizes = [8, 8], strides = [1, 1]} : vector<16x128xf32> to vector<8x8xf32>
    %60 = arith.truncf %59 : vector<8x8xf32> to vector<8x8xbf16>
    %cst_27 = arith.constant dense<0.000000e+00> : vector<8x8xf32>
    %61 = tpu.matmul %56, %58, %cst_27 {dimension_numbers = #tpu.dot_dimension_numbers<[1], [1], [0], [0], [0, 0, 1, 0], [], []>} : vector<8x8xbf16>, vector<8x8xbf16>, vector<8x8xf32> -> vector<8x8xf32>
    %62 = arith.addf %61, %16 : vector<8x8xf32>
    %63 = math.exp %62 : vector<8x8xf32>
    %cst_28 = arith.constant dense<0.000000e+00> : vector<8xf32>
    %64 = vector.multi_reduction <add>, %63, %cst_28 [1] : vector<8x8xf32> to vector<8xf32>
    %65 = vector.shape_cast %64 : vector<8xf32> to vector<8x1xf32>
    %66 = tpu.reciprocal %65 {approx = true} : vector<8x1xf32> -> vector<8x1xf32>
    %67 = vector.broadcast %66 : vector<8x1xf32> to vector<8x8xf32>
    %68 = arith.mulf %63, %67 : vector<8x8xf32>
    %69 = arith.truncf %68 : vector<8x8xf32> to vector<8x8xbf16>
    %cst_29 = arith.constant dense<0.000000e+00> : vector<8x8xf32>
    %70 = tpu.matmul %69, %60, %cst_29 {dimension_numbers = #tpu.dot_dimension_numbers<[1], [0], [0], [1], [0, 0, 1, 1], [], []>} : vector<8x8xbf16>, vector<8x8xbf16>, vector<8x8xf32> -> vector<8x8xf32>
    %c0_30 = arith.constant 0 : index
    %c8 = arith.constant 8 : index
    %71 = vector.load %arg10[%c0_30, %c8] : memref<16x32xf32, #tpu.memory_space<vmem>>, vector<8x8xf32>
    tpu.vector_store %arg10[%c0_30, %c8], %70 {strides = array<i32>} : memref<16x32xf32, #tpu.memory_space<vmem>>, vector<8x8xf32>,
    %72 = vector.extract_strided_slice %37 {offsets = [0, 16], sizes = [8, 8], strides = [1, 1]} : vector<16x128xf32> to vector<8x8xf32>
    %73 = arith.truncf %72 : vector<8x8xf32> to vector<8x8xbf16>
    %74 = vector.extract_strided_slice %37 {offsets = [0, 48], sizes = [8, 8], strides = [1, 1]} : vector<16x128xf32> to vector<8x8xf32>
    %75 = arith.truncf %74 : vector<8x8xf32> to vector<8x8xbf16>
    %76 = vector.extract_strided_slice %37 {offsets = [0, 80], sizes = [8, 8], strides = [1, 1]} : vector<16x128xf32> to vector<8x8xf32>
    %77 = arith.truncf %76 : vector<8x8xf32> to vector<8x8xbf16>
    %cst_31 = arith.constant dense<0.000000e+00> : vector<8x8xf32>
    %78 = tpu.matmul %73, %75, %cst_31 {dimension_numbers = #tpu.dot_dimension_numbers<[1], [1], [0], [0], [0, 0, 1, 0], [], []>} : vector<8x8xbf16>, vector<8x8xbf16>, vector<8x8xf32> -> vector<8x8xf32>
    %79 = arith.addf %78, %16 : vector<8x8xf32>
    %80 = math.exp %79 : vector<8x8xf32>
    %cst_32 = arith.constant dense<0.000000e+00> : vector<8xf32>
    %81 = vector.multi_reduction <add>, %80, %cst_32 [1] : vector<8x8xf32> to vector<8xf32>
    %82 = vector.shape_cast %81 : vector<8xf32> to vector<8x1xf32>
    %83 = tpu.reciprocal %82 {approx = true} : vector<8x1xf32> -> vector<8x1xf32>
    %84 = vector.broadcast %83 : vector<8x1xf32> to vector<8x8xf32>
    %85 = arith.mulf %80, %84 : vector<8x8xf32>
    %86 = arith.truncf %85 : vector<8x8xf32> to vector<8x8xbf16>
    %cst_33 = arith.constant dense<0.000000e+00> : vector<8x8xf32>
    %87 = tpu.matmul %86, %77, %cst_33 {dimension_numbers = #tpu.dot_dimension_numbers<[1], [0], [0], [1], [0, 0, 1, 1], [], []>} : vector<8x8xbf16>, vector<8x8xbf16>, vector<8x8xf32> -> vector<8x8xf32>
    %c0_34 = arith.constant 0 : index
    %c16 = arith.constant 16 : index
    %88 = vector.load %arg10[%c0_34, %c16] : memref<16x32xf32, #tpu.memory_space<vmem>>, vector<8x8xf32>
    tpu.vector_store %arg10[%c0_34, %c16], %87 {strides = array<i32>} : memref<16x32xf32, #tpu.memory_space<vmem>>, vector<8x8xf32>,
    %89 = vector.extract_strided_slice %37 {offsets = [0, 24], sizes = [8, 8], strides = [1, 1]} : vector<16x128xf32> to vector<8x8xf32>
    %90 = arith.truncf %89 : vector<8x8xf32> to vector<8x8xbf16>
    %91 = vector.extract_strided_slice %37 {offsets = [0, 56], sizes = [8, 8], strides = [1, 1]} : vector<16x128xf32> to vector<8x8xf32>
    %92 = arith.truncf %91 : vector<8x8xf32> to vector<8x8xbf16>
    %93 = vector.extract_strided_slice %37 {offsets = [0, 88], sizes = [8, 8], strides = [1, 1]} : vector<16x128xf32> to vector<8x8xf32>
    %94 = arith.truncf %93 : vector<8x8xf32> to vector<8x8xbf16>
    %cst_35 = arith.constant dense<0.000000e+00> : vector<8x8xf32>
    %95 = tpu.matmul %90, %92, %cst_35 {dimension_numbers = #tpu.dot_dimension_numbers<[1], [1], [0], [0], [0, 0, 1, 0], [], []>} : vector<8x8xbf16>, vector<8x8xbf16>, vector<8x8xf32> -> vector<8x8xf32>
    %96 = arith.addf %95, %16 : vector<8x8xf32>
    %97 = math.exp %96 : vector<8x8xf32>
    %cst_36 = arith.constant dense<0.000000e+00> : vector<8xf32>
    %98 = vector.multi_reduction <add>, %97, %cst_36 [1] : vector<8x8xf32> to vector<8xf32>
    %99 = vector.shape_cast %98 : vector<8xf32> to vector<8x1xf32>
    %100 = tpu.reciprocal %99 {approx = true} : vector<8x1xf32> -> vector<8x1xf32>
    %101 = vector.broadcast %100 : vector<8x1xf32> to vector<8x8xf32>
    %102 = arith.mulf %97, %101 : vector<8x8xf32>
    %103 = arith.truncf %102 : vector<8x8xf32> to vector<8x8xbf16>
    %cst_37 = arith.constant dense<0.000000e+00> : vector<8x8xf32>
    %104 = tpu.matmul %103, %94, %cst_37 {dimension_numbers = #tpu.dot_dimension_numbers<[1], [0], [0], [1], [0, 0, 1, 1], [], []>} : vector<8x8xbf16>, vector<8x8xbf16>, vector<8x8xf32> -> vector<8x8xf32>
    %c0_38 = arith.constant 0 : index
    %c24 = arith.constant 24 : index
    %105 = vector.load %arg10[%c0_38, %c24] : memref<16x32xf32, #tpu.memory_space<vmem>>, vector<8x8xf32>
    tpu.vector_store %arg10[%c0_38, %c24], %104 {strides = array<i32>} : memref<16x32xf32, #tpu.memory_space<vmem>>, vector<8x8xf32>,
    %106 = vector.extract_strided_slice %37 {offsets = [8, 0], sizes = [8, 8], strides = [1, 1]} : vector<16x128xf32> to vector<8x8xf32>
    %107 = arith.truncf %106 : vector<8x8xf32> to vector<8x8xbf16>
    %108 = vector.extract_strided_slice %37 {offsets = [8, 32], sizes = [8, 8], strides = [1, 1]} : vector<16x128xf32> to vector<8x8xf32>
    %109 = arith.truncf %108 : vector<8x8xf32> to vector<8x8xbf16>
    %110 = vector.extract_strided_slice %37 {offsets = [8, 64], sizes = [8, 8], strides = [1, 1]} : vector<16x128xf32> to vector<8x8xf32>
    %111 = arith.truncf %110 : vector<8x8xf32> to vector<8x8xbf16>
    %cst_39 = arith.constant dense<0.000000e+00> : vector<8x8xf32>
    %112 = tpu.matmul %107, %109, %cst_39 {dimension_numbers = #tpu.dot_dimension_numbers<[1], [1], [0], [0], [0, 0, 1, 0], [], []>} : vector<8x8xbf16>, vector<8x8xbf16>, vector<8x8xf32> -> vector<8x8xf32>
    %113 = arith.addf %112, %18 : vector<8x8xf32>
    %114 = math.exp %113 : vector<8x8xf32>
    %cst_40 = arith.constant dense<0.000000e+00> : vector<8xf32>
    %115 = vector.multi_reduction <add>, %114, %cst_40 [1] : vector<8x8xf32> to vector<8xf32>
    %116 = vector.shape_cast %115 : vector<8xf32> to vector<8x1xf32>
    %117 = tpu.reciprocal %116 {approx = true} : vector<8x1xf32> -> vector<8x1xf32>
    %118 = vector.broadcast %117 : vector<8x1xf32> to vector<8x8xf32>
    %119 = arith.mulf %114, %118 : vector<8x8xf32>
    %120 = arith.truncf %119 : vector<8x8xf32> to vector<8x8xbf16>
    %cst_41 = arith.constant dense<0.000000e+00> : vector<8x8xf32>
    %121 = tpu.matmul %120, %111, %cst_41 {dimension_numbers = #tpu.dot_dimension_numbers<[1], [0], [0], [1], [0, 0, 1, 1], [], []>} : vector<8x8xbf16>, vector<8x8xbf16>, vector<8x8xf32> -> vector<8x8xf32>
    %c8_42 = arith.constant 8 : index
    %c0_43 = arith.constant 0 : index
    %122 = vector.load %arg10[%c8_42, %c0_43] : memref<16x32xf32, #tpu.memory_space<vmem>>, vector<8x8xf32>
    tpu.vector_store %arg10[%c8_42, %c0_43], %121 {strides = array<i32>} : memref<16x32xf32, #tpu.memory_space<vmem>>, vector<8x8xf32>,
    %123 = vector.extract_strided_slice %37 {offsets = [8, 8], sizes = [8, 8], strides = [1, 1]} : vector<16x128xf32> to vector<8x8xf32>
    %124 = arith.truncf %123 : vector<8x8xf32> to vector<8x8xbf16>
    %125 = vector.extract_strided_slice %37 {offsets = [8, 40], sizes = [8, 8], strides = [1, 1]} : vector<16x128xf32> to vector<8x8xf32>
    %126 = arith.truncf %125 : vector<8x8xf32> to vector<8x8xbf16>
    %127 = vector.extract_strided_slice %37 {offsets = [8, 72], sizes = [8, 8], strides = [1, 1]} : vector<16x128xf32> to vector<8x8xf32>
    %128 = arith.truncf %127 : vector<8x8xf32> to vector<8x8xbf16>
    %cst_44 = arith.constant dense<0.000000e+00> : vector<8x8xf32>
    %129 = tpu.matmul %124, %126, %cst_44 {dimension_numbers = #tpu.dot_dimension_numbers<[1], [1], [0], [0], [0, 0, 1, 0], [], []>} : vector<8x8xbf16>, vector<8x8xbf16>, vector<8x8xf32> -> vector<8x8xf32>
    %130 = arith.addf %129, %18 : vector<8x8xf32>
    %131 = math.exp %130 : vector<8x8xf32>
    %cst_45 = arith.constant dense<0.000000e+00> : vector<8xf32>
    %132 = vector.multi_reduction <add>, %131, %cst_45 [1] : vector<8x8xf32> to vector<8xf32>
    %133 = vector.shape_cast %132 : vector<8xf32> to vector<8x1xf32>
    %134 = tpu.reciprocal %133 {approx = true} : vector<8x1xf32> -> vector<8x1xf32>
    %135 = vector.broadcast %134 : vector<8x1xf32> to vector<8x8xf32>
    %136 = arith.mulf %131, %135 : vector<8x8xf32>
    %137 = arith.truncf %136 : vector<8x8xf32> to vector<8x8xbf16>
    %cst_46 = arith.constant dense<0.000000e+00> : vector<8x8xf32>
    %138 = tpu.matmul %137, %128, %cst_46 {dimension_numbers = #tpu.dot_dimension_numbers<[1], [0], [0], [1], [0, 0, 1, 1], [], []>} : vector<8x8xbf16>, vector<8x8xbf16>, vector<8x8xf32> -> vector<8x8xf32>
    %c8_47 = arith.constant 8 : index
    %c8_48 = arith.constant 8 : index
    %139 = vector.load %arg10[%c8_47, %c8_48] : memref<16x32xf32, #tpu.memory_space<vmem>>, vector<8x8xf32>
    tpu.vector_store %arg10[%c8_47, %c8_48], %138 {strides = array<i32>} : memref<16x32xf32, #tpu.memory_space<vmem>>, vector<8x8xf32>,
    %140 = vector.extract_strided_slice %37 {offsets = [8, 16], sizes = [8, 8], strides = [1, 1]} : vector<16x128xf32> to vector<8x8xf32>
    %141 = arith.truncf %140 : vector<8x8xf32> to vector<8x8xbf16>
    %142 = vector.extract_strided_slice %37 {offsets = [8, 48], sizes = [8, 8], strides = [1, 1]} : vector<16x128xf32> to vector<8x8xf32>
    %143 = arith.truncf %142 : vector<8x8xf32> to vector<8x8xbf16>
    %144 = vector.extract_strided_slice %37 {offsets = [8, 80], sizes = [8, 8], strides = [1, 1]} : vector<16x128xf32> to vector<8x8xf32>
    %145 = arith.truncf %144 : vector<8x8xf32> to vector<8x8xbf16>
    %cst_49 = arith.constant dense<0.000000e+00> : vector<8x8xf32>
    %146 = tpu.matmul %141, %143, %cst_49 {dimension_numbers = #tpu.dot_dimension_numbers<[1], [1], [0], [0], [0, 0, 1, 0], [], []>} : vector<8x8xbf16>, vector<8x8xbf16>, vector<8x8xf32> -> vector<8x8xf32>
    %147 = arith.addf %146, %18 : vector<8x8xf32>
    %148 = math.exp %147 : vector<8x8xf32>
    %cst_50 = arith.constant dense<0.000000e+00> : vector<8xf32>
    %149 = vector.multi_reduction <add>, %148, %cst_50 [1] : vector<8x8xf32> to vector<8xf32>
    %150 = vector.shape_cast %149 : vector<8xf32> to vector<8x1xf32>
    %151 = tpu.reciprocal %150 {approx = true} : vector<8x1xf32> -> vector<8x1xf32>
    %152 = vector.broadcast %151 : vector<8x1xf32> to vector<8x8xf32>
    %153 = arith.mulf %148, %152 : vector<8x8xf32>
    %154 = arith.truncf %153 : vector<8x8xf32> to vector<8x8xbf16>
    %cst_51 = arith.constant dense<0.000000e+00> : vector<8x8xf32>
    %155 = tpu.matmul %154, %145, %cst_51 {dimension_numbers = #tpu.dot_dimension_numbers<[1], [0], [0], [1], [0, 0, 1, 1], [], []>} : vector<8x8xbf16>, vector<8x8xbf16>, vector<8x8xf32> -> vector<8x8xf32>
    %c8_52 = arith.constant 8 : index
    %c16_53 = arith.constant 16 : index
    %156 = vector.load %arg10[%c8_52, %c16_53] : memref<16x32xf32, #tpu.memory_space<vmem>>, vector<8x8xf32>
    tpu.vector_store %arg10[%c8_52, %c16_53], %155 {strides = array<i32>} : memref<16x32xf32, #tpu.memory_space<vmem>>, vector<8x8xf32>,
    %157 = vector.extract_strided_slice %37 {offsets = [8, 24], sizes = [8, 8], strides = [1, 1]} : vector<16x128xf32> to vector<8x8xf32>
    %158 = arith.truncf %157 : vector<8x8xf32> to vector<8x8xbf16>
    %159 = vector.extract_strided_slice %37 {offsets = [8, 56], sizes = [8, 8], strides = [1, 1]} : vector<16x128xf32> to vector<8x8xf32>
    %160 = arith.truncf %159 : vector<8x8xf32> to vector<8x8xbf16>
    %161 = vector.extract_strided_slice %37 {offsets = [8, 88], sizes = [8, 8], strides = [1, 1]} : vector<16x128xf32> to vector<8x8xf32>
    %162 = arith.truncf %161 : vector<8x8xf32> to vector<8x8xbf16>
    %cst_54 = arith.constant dense<0.000000e+00> : vector<8x8xf32>
    %163 = tpu.matmul %158, %160, %cst_54 {dimension_numbers = #tpu.dot_dimension_numbers<[1], [1], [0], [0], [0, 0, 1, 0], [], []>} : vector<8x8xbf16>, vector<8x8xbf16>, vector<8x8xf32> -> vector<8x8xf32>
    %164 = arith.addf %163, %18 : vector<8x8xf32>
    %165 = math.exp %164 : vector<8x8xf32>
    %cst_55 = arith.constant dense<0.000000e+00> : vector<8xf32>
    %166 = vector.multi_reduction <add>, %165, %cst_55 [1] : vector<8x8xf32> to vector<8xf32>
    %167 = vector.shape_cast %166 : vector<8xf32> to vector<8x1xf32>
    %168 = tpu.reciprocal %167 {approx = true} : vector<8x1xf32> -> vector<8x1xf32>
    %169 = vector.broadcast %168 : vector<8x1xf32> to vector<8x8xf32>
    %170 = arith.mulf %165, %169 : vector<8x8xf32>
    %171 = arith.truncf %170 : vector<8x8xf32> to vector<8x8xbf16>
    %cst_56 = arith.constant dense<0.000000e+00> : vector<8x8xf32>
    %172 = tpu.matmul %171, %162, %cst_56 {dimension_numbers = #tpu.dot_dimension_numbers<[1], [0], [0], [1], [0, 0, 1, 1], [], []>} : vector<8x8xbf16>, vector<8x8xbf16>, vector<8x8xf32> -> vector<8x8xf32>
    %c8_57 = arith.constant 8 : index
    %c24_58 = arith.constant 24 : index
    %173 = vector.load %arg10[%c8_57, %c24_58] : memref<16x32xf32, #tpu.memory_space<vmem>>, vector<8x8xf32>
    tpu.vector_store %arg10[%c8_57, %c24_58], %172 {strides = array<i32>} : memref<16x32xf32, #tpu.memory_space<vmem>>, vector<8x8xf32>,
    %c0_59 = arith.constant 0 : index
    %c0_60 = arith.constant 0 : index
    %174 = vector.load %arg10[%c0_59, %c0_60] : memref<16x32xf32, #tpu.memory_space<vmem>>, vector<16x32xf32>
    %175 = arith.truncf %174 : vector<16x32xf32> to vector<16x32xbf16>
    %cst_61 = arith.constant dense<0.000000e+00> : vector<16x32xf32>
    %176 = tpu.matmul %175, %23, %cst_61 {dimension_numbers = #tpu.dot_dimension_numbers<[1], [0], [0], [1], [0, 0, 1, 1], [], []>} : vector<16x32xbf16>, vector<32x32xbf16>, vector<16x32xf32> -> vector<16x32xf32>
    %177 = vector.broadcast %27 : vector<1x32xf32> to vector<16x32xf32>
    %178 = arith.addf %176, %177 : vector<16x32xf32>
    %179 = arith.addf %14, %178 : vector<16x32xf32>
    %cst_62 = arith.constant dense<0.000000e+00> : vector<16xf32>
    %180 = vector.multi_reduction <add>, %179, %cst_62 [1] : vector<16x32xf32> to vector<16xf32>
    %181 = vector.shape_cast %180 : vector<16xf32> to vector<16x1xf32>
    %cst_63 = arith.constant 3.200000e+01 : f32
    %182 = vector.broadcast %cst_63 : f32 to vector<16x1xf32>
    %183 = arith.divf %181, %182 : vector<16x1xf32>
    %184 = vector.broadcast %183 : vector<16x1xf32> to vector<16x32xf32>
    %185 = arith.subf %179, %184 : vector<16x32xf32>
    %186 = arith.mulf %185, %185 : vector<16x32xf32>
    %cst_64 = arith.constant dense<0.000000e+00> : vector<16xf32>
    %187 = vector.multi_reduction <add>, %186, %cst_64 [1] : vector<16x32xf32> to vector<16xf32>
    %188 = vector.shape_cast %187 : vector<16xf32> to vector<16x1xf32>
    %cst_65 = arith.constant 3.200000e+01 : f32
    %189 = vector.broadcast %cst_65 : f32 to vector<16x1xf32>
    %190 = arith.divf %188, %189 : vector<16x1xf32>
    %191 = vector.broadcast %183 : vector<16x1xf32> to vector<16x32xf32>
    %192 = arith.subf %179, %191 : vector<16x32xf32>
    %cst_66 = arith.constant 9.99999974E-6 : f32
    %193 = vector.broadcast %cst_66 : f32 to vector<16x1xf32>
    %194 = arith.addf %190, %193 : vector<16x1xf32>
    %195 = math.rsqrt %194 : vector<16x1xf32>
    %196 = vector.broadcast %195 : vector<16x1xf32> to vector<16x32xf32>
    %197 = arith.mulf %192, %196 : vector<16x32xf32>
    %198 = vector.broadcast %29 : vector<1x32xf32> to vector<16x32xf32>
    %199 = arith.mulf %197, %198 : vector<16x32xf32>
    %200 = vector.broadcast %30 : vector<1x32xf32> to vector<16x32xf32>
    %201 = arith.addf %199, %200 : vector<16x32xf32>
    %202 = arith.truncf %201 : vector<16x32xf32> to vector<16x32xbf16>
    %c0_67 = arith.constant 0 : index
    %c0_68 = arith.constant 0 : index
    %c0_69 = arith.constant 0 : index
    %203 = vector.load %arg5[%c0_67, %c0_68, %c0_69] : memref<2x32x64xbf16, #tpu.memory_space<vmem>>, vector<1x32x64xbf16>
    %204 = vector.shape_cast %203 : vector<1x32x64xbf16> to vector<32x64xbf16>
    %cst_70 = arith.constant dense<0.000000e+00> : vector<16x64xf32>
    %205 = tpu.matmul %202, %204, %cst_70 {dimension_numbers = #tpu.dot_dimension_numbers<[1], [0], [0], [1], [0, 0, 1, 1], [], []>} : vector<16x32xbf16>, vector<32x64xbf16>, vector<16x64xf32> -> vector<16x64xf32>
    %206 = vector.broadcast %28 : vector<1x64xf32> to vector<16x64xf32>
    %207 = arith.addf %205, %206 : vector<16x64xf32>
    %cst_71 = arith.constant 0.000000e+00 : f32
    %208 = vector.broadcast %cst_71 : f32 to vector<16x64xf32>
    %209 = arith.maximumf %207, %208 : vector<16x64xf32>
    %210 = arith.truncf %209 : vector<16x64xf32> to vector<16x64xbf16>
    %c0_72 = arith.constant 0 : index
    %c0_73 = arith.constant 0 : index
    %c0_74 = arith.constant 0 : index
    %211 = vector.load %arg6[%c0_72, %c0_73, %c0_74] : memref<2x64x32xbf16, #tpu.memory_space<vmem>>, vector<1x64x32xbf16>
    %212 = vector.shape_cast %211 : vector<1x64x32xbf16> to vector<64x32xbf16>
    %cst_75 = arith.constant dense<0.000000e+00> : vector<16x32xf32>
    %213 = tpu.matmul %210, %212, %cst_75 {dimension_numbers = #tpu.dot_dimension_numbers<[1], [0], [0], [1], [0, 0, 1, 1], [], []>} : vector<16x64xbf16>, vector<64x32xbf16>, vector<16x32xf32> -> vector<16x32xf32>
    %214 = vector.broadcast %31 : vector<1x32xf32> to vector<16x32xf32>
    %215 = arith.addf %213, %214 : vector<16x32xf32>
    %216 = arith.addf %201, %215 : vector<16x32xf32>
    %cst_76 = arith.constant dense<0.000000e+00> : vector<16xf32>
    %217 = vector.multi_reduction <add>, %216, %cst_76 [1] : vector<16x32xf32> to vector<16xf32>
    %218 = vector.shape_cast %217 : vector<16xf32> to vector<16x1xf32>
    %cst_77 = arith.constant 3.200000e+01 : f32
    %219 = vector.broadcast %cst_77 : f32 to vector<16x1xf32>
    %220 = arith.divf %218, %219 : vector<16x1xf32>
    %221 = vector.broadcast %220 : vector<16x1xf32> to vector<16x32xf32>
    %222 = arith.subf %216, %221 : vector<16x32xf32>
    %223 = arith.mulf %222, %222 : vector<16x32xf32>
    %cst_78 = arith.constant dense<0.000000e+00> : vector<16xf32>
    %224 = vector.multi_reduction <add>, %223, %cst_78 [1] : vector<16x32xf32> to vector<16xf32>
    %225 = vector.shape_cast %224 : vector<16xf32> to vector<16x1xf32>
    %cst_79 = arith.constant 3.200000e+01 : f32
    %226 = vector.broadcast %cst_79 : f32 to vector<16x1xf32>
    %227 = arith.divf %225, %226 : vector<16x1xf32>
    %228 = vector.broadcast %220 : vector<16x1xf32> to vector<16x32xf32>
    %229 = arith.subf %216, %228 : vector<16x32xf32>
    %cst_80 = arith.constant 9.99999974E-6 : f32
    %230 = vector.broadcast %cst_80 : f32 to vector<16x1xf32>
    %231 = arith.addf %227, %230 : vector<16x1xf32>
    %232 = math.rsqrt %231 : vector<16x1xf32>
    %233 = vector.broadcast %232 : vector<16x1xf32> to vector<16x32xf32>
    %234 = arith.mulf %229, %233 : vector<16x32xf32>
    %235 = vector.broadcast %32 : vector<1x32xf32> to vector<16x32xf32>
    %236 = arith.mulf %234, %235 : vector<16x32xf32>
    %237 = vector.broadcast %33 : vector<1x32xf32> to vector<16x32xf32>
    %238 = arith.addf %236, %237 : vector<16x32xf32>
    %c1_81 = arith.constant 1 : index
    %c0_82 = arith.constant 0 : index
    %c0_83 = arith.constant 0 : index
    %239 = vector.load %arg3[%c1_81, %c0_82, %c0_83] : memref<2x32x128xbf16, #tpu.memory_space<vmem>>, vector<1x32x128xbf16>
    %240 = vector.shape_cast %239 : vector<1x32x128xbf16> to vector<32x128xbf16>
    %c1_84 = arith.constant 1 : index
    %c0_85 = arith.constant 0 : index
    %c0_86 = arith.constant 0 : index
    %241 = vector.load %arg4[%c1_84, %c0_85, %c0_86] : memref<2x32x32xbf16, #tpu.memory_space<vmem>>, vector<1x32x32xbf16>
    %242 = vector.shape_cast %241 : vector<1x32x32xbf16> to vector<32x32xbf16>
    %c1_87 = arith.constant 1 : index
    %c0_88 = arith.constant 0 : index
    %c0_89 = arith.constant 0 : index
    %243 = vector.load %arg7[%c1_87, %c0_88, %c0_89] : memref<2x8x128xf32, #tpu.memory_space<vmem>>, vector<1x8x128xf32>
    %244 = vector.shape_cast %243 : vector<1x8x128xf32> to vector<8x128xf32>
    %245 = vector.extract_strided_slice %244 {offsets = [0, 0], sizes = [1, 128], strides = [1, 1]} : vector<8x128xf32> to vector<1x128xf32>
    %246 = vector.extract_strided_slice %244 {offsets = [1, 0], sizes = [1, 32], strides = [1, 1]} : vector<8x128xf32> to vector<1x32xf32>
    %247 = vector.extract_strided_slice %244 {offsets = [2, 0], sizes = [1, 64], strides = [1, 1]} : vector<8x128xf32> to vector<1x64xf32>
    %248 = vector.extract_strided_slice %244 {offsets = [3, 0], sizes = [1, 32], strides = [1, 1]} : vector<8x128xf32> to vector<1x32xf32>
    %249 = vector.extract_strided_slice %244 {offsets = [4, 0], sizes = [1, 32], strides = [1, 1]} : vector<8x128xf32> to vector<1x32xf32>
    %250 = vector.extract_strided_slice %244 {offsets = [5, 0], sizes = [1, 32], strides = [1, 1]} : vector<8x128xf32> to vector<1x32xf32>
    %251 = vector.extract_strided_slice %244 {offsets = [6, 0], sizes = [1, 32], strides = [1, 1]} : vector<8x128xf32> to vector<1x32xf32>
    %252 = vector.extract_strided_slice %244 {offsets = [7, 0], sizes = [1, 32], strides = [1, 1]} : vector<8x128xf32> to vector<1x32xf32>
    %253 = arith.truncf %238 : vector<16x32xf32> to vector<16x32xbf16>
    %cst_90 = arith.constant dense<0.000000e+00> : vector<16x128xf32>
    %254 = tpu.matmul %253, %240, %cst_90 {dimension_numbers = #tpu.dot_dimension_numbers<[1], [0], [0], [1], [0, 0, 1, 1], [], []>} : vector<16x32xbf16>, vector<32x128xbf16>, vector<16x128xf32> -> vector<16x128xf32>
    %255 = vector.broadcast %245 : vector<1x128xf32> to vector<16x128xf32>
    %256 = arith.addf %254, %255 : vector<16x128xf32>
    %257 = vector.extract_strided_slice %256 {offsets = [0, 0], sizes = [8, 8], strides = [1, 1]} : vector<16x128xf32> to vector<8x8xf32>
    %258 = arith.truncf %257 : vector<8x8xf32> to vector<8x8xbf16>
    %259 = vector.extract_strided_slice %256 {offsets = [0, 32], sizes = [8, 8], strides = [1, 1]} : vector<16x128xf32> to vector<8x8xf32>
    %260 = arith.truncf %259 : vector<8x8xf32> to vector<8x8xbf16>
    %261 = vector.extract_strided_slice %256 {offsets = [0, 64], sizes = [8, 8], strides = [1, 1]} : vector<16x128xf32> to vector<8x8xf32>
    %262 = arith.truncf %261 : vector<8x8xf32> to vector<8x8xbf16>
    %cst_91 = arith.constant dense<0.000000e+00> : vector<8x8xf32>
    %263 = tpu.matmul %258, %260, %cst_91 {dimension_numbers = #tpu.dot_dimension_numbers<[1], [1], [0], [0], [0, 0, 1, 0], [], []>} : vector<8x8xbf16>, vector<8x8xbf16>, vector<8x8xf32> -> vector<8x8xf32>
    %264 = arith.addf %263, %16 : vector<8x8xf32>
    %265 = math.exp %264 : vector<8x8xf32>
    %cst_92 = arith.constant dense<0.000000e+00> : vector<8xf32>
    %266 = vector.multi_reduction <add>, %265, %cst_92 [1] : vector<8x8xf32> to vector<8xf32>
    %267 = vector.shape_cast %266 : vector<8xf32> to vector<8x1xf32>
    %268 = tpu.reciprocal %267 {approx = true} : vector<8x1xf32> -> vector<8x1xf32>
    %269 = vector.broadcast %268 : vector<8x1xf32> to vector<8x8xf32>
    %270 = arith.mulf %265, %269 : vector<8x8xf32>
    %271 = arith.truncf %270 : vector<8x8xf32> to vector<8x8xbf16>
    %cst_93 = arith.constant dense<0.000000e+00> : vector<8x8xf32>
    %272 = tpu.matmul %271, %262, %cst_93 {dimension_numbers = #tpu.dot_dimension_numbers<[1], [0], [0], [1], [0, 0, 1, 1], [], []>} : vector<8x8xbf16>, vector<8x8xbf16>, vector<8x8xf32> -> vector<8x8xf32>
    %c0_94 = arith.constant 0 : index
    %c0_95 = arith.constant 0 : index
    %273 = vector.load %arg10[%c0_94, %c0_95] : memref<16x32xf32, #tpu.memory_space<vmem>>, vector<8x8xf32>
    tpu.vector_store %arg10[%c0_94, %c0_95], %272 {strides = array<i32>} : memref<16x32xf32, #tpu.memory_space<vmem>>, vector<8x8xf32>,
    %274 = vector.extract_strided_slice %256 {offsets = [0, 8], sizes = [8, 8], strides = [1, 1]} : vector<16x128xf32> to vector<8x8xf32>
    %275 = arith.truncf %274 : vector<8x8xf32> to vector<8x8xbf16>
    %276 = vector.extract_strided_slice %256 {offsets = [0, 40], sizes = [8, 8], strides = [1, 1]} : vector<16x128xf32> to vector<8x8xf32>
    %277 = arith.truncf %276 : vector<8x8xf32> to vector<8x8xbf16>
    %278 = vector.extract_strided_slice %256 {offsets = [0, 72], sizes = [8, 8], strides = [1, 1]} : vector<16x128xf32> to vector<8x8xf32>
    %279 = arith.truncf %278 : vector<8x8xf32> to vector<8x8xbf16>
    %cst_96 = arith.constant dense<0.000000e+00> : vector<8x8xf32>
    %280 = tpu.matmul %275, %277, %cst_96 {dimension_numbers = #tpu.dot_dimension_numbers<[1], [1], [0], [0], [0, 0, 1, 0], [], []>} : vector<8x8xbf16>, vector<8x8xbf16>, vector<8x8xf32> -> vector<8x8xf32>
    %281 = arith.addf %280, %16 : vector<8x8xf32>
    %282 = math.exp %281 : vector<8x8xf32>
    %cst_97 = arith.constant dense<0.000000e+00> : vector<8xf32>
    %283 = vector.multi_reduction <add>, %282, %cst_97 [1] : vector<8x8xf32> to vector<8xf32>
    %284 = vector.shape_cast %283 : vector<8xf32> to vector<8x1xf32>
    %285 = tpu.reciprocal %284 {approx = true} : vector<8x1xf32> -> vector<8x1xf32>
    %286 = vector.broadcast %285 : vector<8x1xf32> to vector<8x8xf32>
    %287 = arith.mulf %282, %286 : vector<8x8xf32>
    %288 = arith.truncf %287 : vector<8x8xf32> to vector<8x8xbf16>
    %cst_98 = arith.constant dense<0.000000e+00> : vector<8x8xf32>
    %289 = tpu.matmul %288, %279, %cst_98 {dimension_numbers = #tpu.dot_dimension_numbers<[1], [0], [0], [1], [0, 0, 1, 1], [], []>} : vector<8x8xbf16>, vector<8x8xbf16>, vector<8x8xf32> -> vector<8x8xf32>
    %c0_99 = arith.constant 0 : index
    %c8_100 = arith.constant 8 : index
    %290 = vector.load %arg10[%c0_99, %c8_100] : memref<16x32xf32, #tpu.memory_space<vmem>>, vector<8x8xf32>
    tpu.vector_store %arg10[%c0_99, %c8_100], %289 {strides = array<i32>} : memref<16x32xf32, #tpu.memory_space<vmem>>, vector<8x8xf32>,
    %291 = vector.extract_strided_slice %256 {offsets = [0, 16], sizes = [8, 8], strides = [1, 1]} : vector<16x128xf32> to vector<8x8xf32>
    %292 = arith.truncf %291 : vector<8x8xf32> to vector<8x8xbf16>
    %293 = vector.extract_strided_slice %256 {offsets = [0, 48], sizes = [8, 8], strides = [1, 1]} : vector<16x128xf32> to vector<8x8xf32>
    %294 = arith.truncf %293 : vector<8x8xf32> to vector<8x8xbf16>
    %295 = vector.extract_strided_slice %256 {offsets = [0, 80], sizes = [8, 8], strides = [1, 1]} : vector<16x128xf32> to vector<8x8xf32>
    %296 = arith.truncf %295 : vector<8x8xf32> to vector<8x8xbf16>
    %cst_101 = arith.constant dense<0.000000e+00> : vector<8x8xf32>
    %297 = tpu.matmul %292, %294, %cst_101 {dimension_numbers = #tpu.dot_dimension_numbers<[1], [1], [0], [0], [0, 0, 1, 0], [], []>} : vector<8x8xbf16>, vector<8x8xbf16>, vector<8x8xf32> -> vector<8x8xf32>
    %298 = arith.addf %297, %16 : vector<8x8xf32>
    %299 = math.exp %298 : vector<8x8xf32>
    %cst_102 = arith.constant dense<0.000000e+00> : vector<8xf32>
    %300 = vector.multi_reduction <add>, %299, %cst_102 [1] : vector<8x8xf32> to vector<8xf32>
    %301 = vector.shape_cast %300 : vector<8xf32> to vector<8x1xf32>
    %302 = tpu.reciprocal %301 {approx = true} : vector<8x1xf32> -> vector<8x1xf32>
    %303 = vector.broadcast %302 : vector<8x1xf32> to vector<8x8xf32>
    %304 = arith.mulf %299, %303 : vector<8x8xf32>
    %305 = arith.truncf %304 : vector<8x8xf32> to vector<8x8xbf16>
    %cst_103 = arith.constant dense<0.000000e+00> : vector<8x8xf32>
    %306 = tpu.matmul %305, %296, %cst_103 {dimension_numbers = #tpu.dot_dimension_numbers<[1], [0], [0], [1], [0, 0, 1, 1], [], []>} : vector<8x8xbf16>, vector<8x8xbf16>, vector<8x8xf32> -> vector<8x8xf32>
    %c0_104 = arith.constant 0 : index
    %c16_105 = arith.constant 16 : index
    %307 = vector.load %arg10[%c0_104, %c16_105] : memref<16x32xf32, #tpu.memory_space<vmem>>, vector<8x8xf32>
    tpu.vector_store %arg10[%c0_104, %c16_105], %306 {strides = array<i32>} : memref<16x32xf32, #tpu.memory_space<vmem>>, vector<8x8xf32>,
    %308 = vector.extract_strided_slice %256 {offsets = [0, 24], sizes = [8, 8], strides = [1, 1]} : vector<16x128xf32> to vector<8x8xf32>
    %309 = arith.truncf %308 : vector<8x8xf32> to vector<8x8xbf16>
    %310 = vector.extract_strided_slice %256 {offsets = [0, 56], sizes = [8, 8], strides = [1, 1]} : vector<16x128xf32> to vector<8x8xf32>
    %311 = arith.truncf %310 : vector<8x8xf32> to vector<8x8xbf16>
    %312 = vector.extract_strided_slice %256 {offsets = [0, 88], sizes = [8, 8], strides = [1, 1]} : vector<16x128xf32> to vector<8x8xf32>
    %313 = arith.truncf %312 : vector<8x8xf32> to vector<8x8xbf16>
    %cst_106 = arith.constant dense<0.000000e+00> : vector<8x8xf32>
    %314 = tpu.matmul %309, %311, %cst_106 {dimension_numbers = #tpu.dot_dimension_numbers<[1], [1], [0], [0], [0, 0, 1, 0], [], []>} : vector<8x8xbf16>, vector<8x8xbf16>, vector<8x8xf32> -> vector<8x8xf32>
    %315 = arith.addf %314, %16 : vector<8x8xf32>
    %316 = math.exp %315 : vector<8x8xf32>
    %cst_107 = arith.constant dense<0.000000e+00> : vector<8xf32>
    %317 = vector.multi_reduction <add>, %316, %cst_107 [1] : vector<8x8xf32> to vector<8xf32>
    %318 = vector.shape_cast %317 : vector<8xf32> to vector<8x1xf32>
    %319 = tpu.reciprocal %318 {approx = true} : vector<8x1xf32> -> vector<8x1xf32>
    %320 = vector.broadcast %319 : vector<8x1xf32> to vector<8x8xf32>
    %321 = arith.mulf %316, %320 : vector<8x8xf32>
    %322 = arith.truncf %321 : vector<8x8xf32> to vector<8x8xbf16>
    %cst_108 = arith.constant dense<0.000000e+00> : vector<8x8xf32>
    %323 = tpu.matmul %322, %313, %cst_108 {dimension_numbers = #tpu.dot_dimension_numbers<[1], [0], [0], [1], [0, 0, 1, 1], [], []>} : vector<8x8xbf16>, vector<8x8xbf16>, vector<8x8xf32> -> vector<8x8xf32>
    %c0_109 = arith.constant 0 : index
    %c24_110 = arith.constant 24 : index
    %324 = vector.load %arg10[%c0_109, %c24_110] : memref<16x32xf32, #tpu.memory_space<vmem>>, vector<8x8xf32>
    tpu.vector_store %arg10[%c0_109, %c24_110], %323 {strides = array<i32>} : memref<16x32xf32, #tpu.memory_space<vmem>>, vector<8x8xf32>,
    %325 = vector.extract_strided_slice %256 {offsets = [8, 0], sizes = [8, 8], strides = [1, 1]} : vector<16x128xf32> to vector<8x8xf32>
    %326 = arith.truncf %325 : vector<8x8xf32> to vector<8x8xbf16>
    %327 = vector.extract_strided_slice %256 {offsets = [8, 32], sizes = [8, 8], strides = [1, 1]} : vector<16x128xf32> to vector<8x8xf32>
    %328 = arith.truncf %327 : vector<8x8xf32> to vector<8x8xbf16>
    %329 = vector.extract_strided_slice %256 {offsets = [8, 64], sizes = [8, 8], strides = [1, 1]} : vector<16x128xf32> to vector<8x8xf32>
    %330 = arith.truncf %329 : vector<8x8xf32> to vector<8x8xbf16>
    %cst_111 = arith.constant dense<0.000000e+00> : vector<8x8xf32>
    %331 = tpu.matmul %326, %328, %cst_111 {dimension_numbers = #tpu.dot_dimension_numbers<[1], [1], [0], [0], [0, 0, 1, 0], [], []>} : vector<8x8xbf16>, vector<8x8xbf16>, vector<8x8xf32> -> vector<8x8xf32>
    %332 = arith.addf %331, %18 : vector<8x8xf32>
    %333 = math.exp %332 : vector<8x8xf32>
    %cst_112 = arith.constant dense<0.000000e+00> : vector<8xf32>
    %334 = vector.multi_reduction <add>, %333, %cst_112 [1] : vector<8x8xf32> to vector<8xf32>
    %335 = vector.shape_cast %334 : vector<8xf32> to vector<8x1xf32>
    %336 = tpu.reciprocal %335 {approx = true} : vector<8x1xf32> -> vector<8x1xf32>
    %337 = vector.broadcast %336 : vector<8x1xf32> to vector<8x8xf32>
    %338 = arith.mulf %333, %337 : vector<8x8xf32>
    %339 = arith.truncf %338 : vector<8x8xf32> to vector<8x8xbf16>
    %cst_113 = arith.constant dense<0.000000e+00> : vector<8x8xf32>
    %340 = tpu.matmul %339, %330, %cst_113 {dimension_numbers = #tpu.dot_dimension_numbers<[1], [0], [0], [1], [0, 0, 1, 1], [], []>} : vector<8x8xbf16>, vector<8x8xbf16>, vector<8x8xf32> -> vector<8x8xf32>
    %c8_114 = arith.constant 8 : index
    %c0_115 = arith.constant 0 : index
    %341 = vector.load %arg10[%c8_114, %c0_115] : memref<16x32xf32, #tpu.memory_space<vmem>>, vector<8x8xf32>
    tpu.vector_store %arg10[%c8_114, %c0_115], %340 {strides = array<i32>} : memref<16x32xf32, #tpu.memory_space<vmem>>, vector<8x8xf32>,
    %342 = vector.extract_strided_slice %256 {offsets = [8, 8], sizes = [8, 8], strides = [1, 1]} : vector<16x128xf32> to vector<8x8xf32>
    %343 = arith.truncf %342 : vector<8x8xf32> to vector<8x8xbf16>
    %344 = vector.extract_strided_slice %256 {offsets = [8, 40], sizes = [8, 8], strides = [1, 1]} : vector<16x128xf32> to vector<8x8xf32>
    %345 = arith.truncf %344 : vector<8x8xf32> to vector<8x8xbf16>
    %346 = vector.extract_strided_slice %256 {offsets = [8, 72], sizes = [8, 8], strides = [1, 1]} : vector<16x128xf32> to vector<8x8xf32>
    %347 = arith.truncf %346 : vector<8x8xf32> to vector<8x8xbf16>
    %cst_116 = arith.constant dense<0.000000e+00> : vector<8x8xf32>
    %348 = tpu.matmul %343, %345, %cst_116 {dimension_numbers = #tpu.dot_dimension_numbers<[1], [1], [0], [0], [0, 0, 1, 0], [], []>} : vector<8x8xbf16>, vector<8x8xbf16>, vector<8x8xf32> -> vector<8x8xf32>
    %349 = arith.addf %348, %18 : vector<8x8xf32>
    %350 = math.exp %349 : vector<8x8xf32>
    %cst_117 = arith.constant dense<0.000000e+00> : vector<8xf32>
    %351 = vector.multi_reduction <add>, %350, %cst_117 [1] : vector<8x8xf32> to vector<8xf32>
    %352 = vector.shape_cast %351 : vector<8xf32> to vector<8x1xf32>
    %353 = tpu.reciprocal %352 {approx = true} : vector<8x1xf32> -> vector<8x1xf32>
    %354 = vector.broadcast %353 : vector<8x1xf32> to vector<8x8xf32>
    %355 = arith.mulf %350, %354 : vector<8x8xf32>
    %356 = arith.truncf %355 : vector<8x8xf32> to vector<8x8xbf16>
    %cst_118 = arith.constant dense<0.000000e+00> : vector<8x8xf32>
    %357 = tpu.matmul %356, %347, %cst_118 {dimension_numbers = #tpu.dot_dimension_numbers<[1], [0], [0], [1], [0, 0, 1, 1], [], []>} : vector<8x8xbf16>, vector<8x8xbf16>, vector<8x8xf32> -> vector<8x8xf32>
    %c8_119 = arith.constant 8 : index
    %c8_120 = arith.constant 8 : index
    %358 = vector.load %arg10[%c8_119, %c8_120] : memref<16x32xf32, #tpu.memory_space<vmem>>, vector<8x8xf32>
    tpu.vector_store %arg10[%c8_119, %c8_120], %357 {strides = array<i32>} : memref<16x32xf32, #tpu.memory_space<vmem>>, vector<8x8xf32>,
    %359 = vector.extract_strided_slice %256 {offsets = [8, 16], sizes = [8, 8], strides = [1, 1]} : vector<16x128xf32> to vector<8x8xf32>
    %360 = arith.truncf %359 : vector<8x8xf32> to vector<8x8xbf16>
    %361 = vector.extract_strided_slice %256 {offsets = [8, 48], sizes = [8, 8], strides = [1, 1]} : vector<16x128xf32> to vector<8x8xf32>
    %362 = arith.truncf %361 : vector<8x8xf32> to vector<8x8xbf16>
    %363 = vector.extract_strided_slice %256 {offsets = [8, 80], sizes = [8, 8], strides = [1, 1]} : vector<16x128xf32> to vector<8x8xf32>
    %364 = arith.truncf %363 : vector<8x8xf32> to vector<8x8xbf16>
    %cst_121 = arith.constant dense<0.000000e+00> : vector<8x8xf32>
    %365 = tpu.matmul %360, %362, %cst_121 {dimension_numbers = #tpu.dot_dimension_numbers<[1], [1], [0], [0], [0, 0, 1, 0], [], []>} : vector<8x8xbf16>, vector<8x8xbf16>, vector<8x8xf32> -> vector<8x8xf32>
    %366 = arith.addf %365, %18 : vector<8x8xf32>
    %367 = math.exp %366 : vector<8x8xf32>
    %cst_122 = arith.constant dense<0.000000e+00> : vector<8xf32>
    %368 = vector.multi_reduction <add>, %367, %cst_122 [1] : vector<8x8xf32> to vector<8xf32>
    %369 = vector.shape_cast %368 : vector<8xf32> to vector<8x1xf32>
    %370 = tpu.reciprocal %369 {approx = true} : vector<8x1xf32> -> vector<8x1xf32>
    %371 = vector.broadcast %370 : vector<8x1xf32> to vector<8x8xf32>
    %372 = arith.mulf %367, %371 : vector<8x8xf32>
    %373 = arith.truncf %372 : vector<8x8xf32> to vector<8x8xbf16>
    %cst_123 = arith.constant dense<0.000000e+00> : vector<8x8xf32>
    %374 = tpu.matmul %373, %364, %cst_123 {dimension_numbers = #tpu.dot_dimension_numbers<[1], [0], [0], [1], [0, 0, 1, 1], [], []>} : vector<8x8xbf16>, vector<8x8xbf16>, vector<8x8xf32> -> vector<8x8xf32>
    %c8_124 = arith.constant 8 : index
    %c16_125 = arith.constant 16 : index
    %375 = vector.load %arg10[%c8_124, %c16_125] : memref<16x32xf32, #tpu.memory_space<vmem>>, vector<8x8xf32>
    tpu.vector_store %arg10[%c8_124, %c16_125], %374 {strides = array<i32>} : memref<16x32xf32, #tpu.memory_space<vmem>>, vector<8x8xf32>,
    %376 = vector.extract_strided_slice %256 {offsets = [8, 24], sizes = [8, 8], strides = [1, 1]} : vector<16x128xf32> to vector<8x8xf32>
    %377 = arith.truncf %376 : vector<8x8xf32> to vector<8x8xbf16>
    %378 = vector.extract_strided_slice %256 {offsets = [8, 56], sizes = [8, 8], strides = [1, 1]} : vector<16x128xf32> to vector<8x8xf32>
    %379 = arith.truncf %378 : vector<8x8xf32> to vector<8x8xbf16>
    %380 = vector.extract_strided_slice %256 {offsets = [8, 88], sizes = [8, 8], strides = [1, 1]} : vector<16x128xf32> to vector<8x8xf32>
    %381 = arith.truncf %380 : vector<8x8xf32> to vector<8x8xbf16>
    %cst_126 = arith.constant dense<0.000000e+00> : vector<8x8xf32>
    %382 = tpu.matmul %377, %379, %cst_126 {dimension_numbers = #tpu.dot_dimension_numbers<[1], [1], [0], [0], [0, 0, 1, 0], [], []>} : vector<8x8xbf16>, vector<8x8xbf16>, vector<8x8xf32> -> vector<8x8xf32>
    %383 = arith.addf %382, %18 : vector<8x8xf32>
    %384 = math.exp %383 : vector<8x8xf32>
    %cst_127 = arith.constant dense<0.000000e+00> : vector<8xf32>
    %385 = vector.multi_reduction <add>, %384, %cst_127 [1] : vector<8x8xf32> to vector<8xf32>
    %386 = vector.shape_cast %385 : vector<8xf32> to vector<8x1xf32>
    %387 = tpu.reciprocal %386 {approx = true} : vector<8x1xf32> -> vector<8x1xf32>
    %388 = vector.broadcast %387 : vector<8x1xf32> to vector<8x8xf32>
    %389 = arith.mulf %384, %388 : vector<8x8xf32>
    %390 = arith.truncf %389 : vector<8x8xf32> to vector<8x8xbf16>
    %cst_128 = arith.constant dense<0.000000e+00> : vector<8x8xf32>
    %391 = tpu.matmul %390, %381, %cst_128 {dimension_numbers = #tpu.dot_dimension_numbers<[1], [0], [0], [1], [0, 0, 1, 1], [], []>} : vector<8x8xbf16>, vector<8x8xbf16>, vector<8x8xf32> -> vector<8x8xf32>
    %c8_129 = arith.constant 8 : index
    %c24_130 = arith.constant 24 : index
    %392 = vector.load %arg10[%c8_129, %c24_130] : memref<16x32xf32, #tpu.memory_space<vmem>>, vector<8x8xf32>
    tpu.vector_store %arg10[%c8_129, %c24_130], %391 {strides = array<i32>} : memref<16x32xf32, #tpu.memory_space<vmem>>, vector<8x8xf32>,
    %c0_131 = arith.constant 0 : index
    %c0_132 = arith.constant 0 : index
    %393 = vector.load %arg10[%c0_131, %c0_132] : memref<16x32xf32, #tpu.memory_space<vmem>>, vector<16x32xf32>
    %394 = arith.truncf %393 : vector<16x32xf32> to vector<16x32xbf16>
    %cst_133 = arith.constant dense<0.000000e+00> : vector<16x32xf32>
    %395 = tpu.matmul %394, %242, %cst_133 {dimension_numbers = #tpu.dot_dimension_numbers<[1], [0], [0], [1], [0, 0, 1, 1], [], []>} : vector<16x32xbf16>, vector<32x32xbf16>, vector<16x32xf32> -> vector<16x32xf32>
    %396 = vector.broadcast %246 : vector<1x32xf32> to vector<16x32xf32>
    %397 = arith.addf %395, %396 : vector<16x32xf32>
    %398 = arith.addf %238, %397 : vector<16x32xf32>
    %cst_134 = arith.constant dense<0.000000e+00> : vector<16xf32>
    %399 = vector.multi_reduction <add>, %398, %cst_134 [1] : vector<16x32xf32> to vector<16xf32>
    %400 = vector.shape_cast %399 : vector<16xf32> to vector<16x1xf32>
    %cst_135 = arith.constant 3.200000e+01 : f32
    %401 = vector.broadcast %cst_135 : f32 to vector<16x1xf32>
    %402 = arith.divf %400, %401 : vector<16x1xf32>
    %403 = vector.broadcast %402 : vector<16x1xf32> to vector<16x32xf32>
    %404 = arith.subf %398, %403 : vector<16x32xf32>
    %405 = arith.mulf %404, %404 : vector<16x32xf32>
    %cst_136 = arith.constant dense<0.000000e+00> : vector<16xf32>
    %406 = vector.multi_reduction <add>, %405, %cst_136 [1] : vector<16x32xf32> to vector<16xf32>
    %407 = vector.shape_cast %406 : vector<16xf32> to vector<16x1xf32>
    %cst_137 = arith.constant 3.200000e+01 : f32
    %408 = vector.broadcast %cst_137 : f32 to vector<16x1xf32>
    %409 = arith.divf %407, %408 : vector<16x1xf32>
    %410 = vector.broadcast %402 : vector<16x1xf32> to vector<16x32xf32>
    %411 = arith.subf %398, %410 : vector<16x32xf32>
    %cst_138 = arith.constant 9.99999974E-6 : f32
    %412 = vector.broadcast %cst_138 : f32 to vector<16x1xf32>
    %413 = arith.addf %409, %412 : vector<16x1xf32>
    %414 = math.rsqrt %413 : vector<16x1xf32>
    %415 = vector.broadcast %414 : vector<16x1xf32> to vector<16x32xf32>
    %416 = arith.mulf %411, %415 : vector<16x32xf32>
    %417 = vector.broadcast %248 : vector<1x32xf32> to vector<16x32xf32>
    %418 = arith.mulf %416, %417 : vector<16x32xf32>
    %419 = vector.broadcast %249 : vector<1x32xf32> to vector<16x32xf32>
    %420 = arith.addf %418, %419 : vector<16x32xf32>
    %421 = arith.truncf %420 : vector<16x32xf32> to vector<16x32xbf16>
    %c1_139 = arith.constant 1 : index
    %c0_140 = arith.constant 0 : index
    %c0_141 = arith.constant 0 : index
    %422 = vector.load %arg5[%c1_139, %c0_140, %c0_141] : memref<2x32x64xbf16, #tpu.memory_space<vmem>>, vector<1x32x64xbf16>
    %423 = vector.shape_cast %422 : vector<1x32x64xbf16> to vector<32x64xbf16>
    %cst_142 = arith.constant dense<0.000000e+00> : vector<16x64xf32>
    %424 = tpu.matmul %421, %423, %cst_142 {dimension_numbers = #tpu.dot_dimension_numbers<[1], [0], [0], [1], [0, 0, 1, 1], [], []>} : vector<16x32xbf16>, vector<32x64xbf16>, vector<16x64xf32> -> vector<16x64xf32>
    %425 = vector.broadcast %247 : vector<1x64xf32> to vector<16x64xf32>
    %426 = arith.addf %424, %425 : vector<16x64xf32>
    %cst_143 = arith.constant 0.000000e+00 : f32
    %427 = vector.broadcast %cst_143 : f32 to vector<16x64xf32>
    %428 = arith.maximumf %426, %427 : vector<16x64xf32>
    %429 = arith.truncf %428 : vector<16x64xf32> to vector<16x64xbf16>
    %c1_144 = arith.constant 1 : index
    %c0_145 = arith.constant 0 : index
    %c0_146 = arith.constant 0 : index
    %430 = vector.load %arg6[%c1_144, %c0_145, %c0_146] : memref<2x64x32xbf16, #tpu.memory_space<vmem>>, vector<1x64x32xbf16>
    %431 = vector.shape_cast %430 : vector<1x64x32xbf16> to vector<64x32xbf16>
    %cst_147 = arith.constant dense<0.000000e+00> : vector<16x32xf32>
    %432 = tpu.matmul %429, %431, %cst_147 {dimension_numbers = #tpu.dot_dimension_numbers<[1], [0], [0], [1], [0, 0, 1, 1], [], []>} : vector<16x64xbf16>, vector<64x32xbf16>, vector<16x32xf32> -> vector<16x32xf32>
    %433 = vector.broadcast %250 : vector<1x32xf32> to vector<16x32xf32>
    %434 = arith.addf %432, %433 : vector<16x32xf32>
    %435 = arith.addf %420, %434 : vector<16x32xf32>
    %cst_148 = arith.constant dense<0.000000e+00> : vector<16xf32>
    %436 = vector.multi_reduction <add>, %435, %cst_148 [1] : vector<16x32xf32> to vector<16xf32>
    %437 = vector.shape_cast %436 : vector<16xf32> to vector<16x1xf32>
    %cst_149 = arith.constant 3.200000e+01 : f32
    %438 = vector.broadcast %cst_149 : f32 to vector<16x1xf32>
    %439 = arith.divf %437, %438 : vector<16x1xf32>
    %440 = vector.broadcast %439 : vector<16x1xf32> to vector<16x32xf32>
    %441 = arith.subf %435, %440 : vector<16x32xf32>
    %442 = arith.mulf %441, %441 : vector<16x32xf32>
    %cst_150 = arith.constant dense<0.000000e+00> : vector<16xf32>
    %443 = vector.multi_reduction <add>, %442, %cst_150 [1] : vector<16x32xf32> to vector<16xf32>
    %444 = vector.shape_cast %443 : vector<16xf32> to vector<16x1xf32>
    %cst_151 = arith.constant 3.200000e+01 : f32
    %445 = vector.broadcast %cst_151 : f32 to vector<16x1xf32>
    %446 = arith.divf %444, %445 : vector<16x1xf32>
    %447 = vector.broadcast %439 : vector<16x1xf32> to vector<16x32xf32>
    %448 = arith.subf %435, %447 : vector<16x32xf32>
    %cst_152 = arith.constant 9.99999974E-6 : f32
    %449 = vector.broadcast %cst_152 : f32 to vector<16x1xf32>
    %450 = arith.addf %446, %449 : vector<16x1xf32>
    %451 = math.rsqrt %450 : vector<16x1xf32>
    %452 = vector.broadcast %451 : vector<16x1xf32> to vector<16x32xf32>
    %453 = arith.mulf %448, %452 : vector<16x32xf32>
    %454 = vector.broadcast %251 : vector<1x32xf32> to vector<16x32xf32>
    %455 = arith.mulf %453, %454 : vector<16x32xf32>
    %456 = vector.broadcast %252 : vector<1x32xf32> to vector<16x32xf32>
    %457 = arith.addf %455, %456 : vector<16x32xf32>
    %458 = arith.truncf %457 : vector<16x32xf32> to vector<16x32xbf16>
    %459 = vector.extract_strided_slice %458 {offsets = [0, 0], sizes = [8, 32], strides = [1, 1]} : vector<16x32xbf16> to vector<8x32xbf16>
    %cst_153 = arith.constant dense<0.000000e+00> : vector<8x64xf32>
    %460 = tpu.matmul %459, %19, %cst_153 {dimension_numbers = #tpu.dot_dimension_numbers<[1], [0], [0], [1], [0, 0, 1, 1], [], []>} : vector<8x32xbf16>, vector<32x64xbf16>, vector<8x64xf32> -> vector<8x64xf32>
    %c0_154 = arith.constant 0 : index
    %c0_155 = arith.constant 0 : index
    %461 = vector.load %arg9[%c0_154, %c0_155] : memref<8x128xf32, #tpu.memory_space<vmem>>, vector<8x64xf32>
    tpu.vector_store %arg9[%c0_154, %c0_155], %460 {strides = array<i32>} : memref<8x128xf32, #tpu.memory_space<vmem>>, vector<8x64xf32>,
    %462 = vector.extract_strided_slice %458 {offsets = [8, 0], sizes = [8, 32], strides = [1, 1]} : vector<16x32xbf16> to vector<8x32xbf16>
    %cst_156 = arith.constant dense<0.000000e+00> : vector<8x64xf32>
    %463 = tpu.matmul %462, %19, %cst_156 {dimension_numbers = #tpu.dot_dimension_numbers<[1], [0], [0], [1], [0, 0, 1, 1], [], []>} : vector<8x32xbf16>, vector<32x64xbf16>, vector<8x64xf32> -> vector<8x64xf32>
    %c0_157 = arith.constant 0 : index
    %c64 = arith.constant 64 : index
    %464 = vector.load %arg9[%c0_157, %c64] : memref<8x128xf32, #tpu.memory_space<vmem>>, vector<8x64xf32>
    tpu.vector_store %arg9[%c0_157, %c64], %463 {strides = array<i32>} : memref<8x128xf32, #tpu.memory_space<vmem>>, vector<8x64xf32>,
    return
  }
}

</mosaic_0001>

<bundles_post_ra>
// kernel: tile.8
= control target key start
LH: loop header
LB: loop body
LE: loop exit
PB: predicated region body
PF: predicated region fallthrough
CT: control target
= control target key end

     0   :  { %s22_s0 = inlined_call_operand.vmem [shape: s32[8], index: 0, kind: input, shape index: {}]   ;;  %s23_s1 = inlined_call_operand.vmem [shape: s32[2,8], index: 1, kind: output, shape index: {}]  }
   0x1   :  { %v4_v0 = vld [vmem:[%s22_s0] ss:$0 sm:$0xff] }
   0x2   :  { %5 = vst [vmem:[%s23_s1] sm:$0x3] %v4_v0 }

// kernel: tile.9
= control target key start
LH: loop header
LB: loop body
LE: loop exit
PB: predicated region body
PF: predicated region fallthrough
CT: control target
= control target key end

     0   :  { %vm8_vm0 = vcmask 64512   ;;  %vm14_vm1 = vcmask 130112   ;;  %s42_s0 = inlined_call_operand.vmem [shape: s32[2,8], index: 0, kind: input, shape index: {}]   ;;  %s43_s1 = inlined_call_operand.vmem [shape: s32[16,1], index: 1, kind: output, shape index: {}]  }
   0x1   :  { %v5_v0 = vld [vmem:[%s42_s0] sm:$0x3]  ;;  %s25_s0 = smov 8  }
   0x2   :  { %6 = vst [vmem:[#allocation1] sm:$0x3] %v5_v0 }
   0x9   :  { %v11_v1 = vld [vmem:[#allocation1 + $0x1] sm:$0x1]   ;;  %v7_v2 = vld [vmem:[#allocation1] sm:$0x1]  }
   0xa   :  { %12 = vrot.lane.b32.xlu0 %v11_v1, %s25_s0  ;;  %9 = vst.msk [vmem:[#allocation0] sm:$0x1] %vm8_vm0, %v7_v2  }
  0x7c   :  { %v13_v3 = vpop.permute.xlu0 %12  }
  0x7d   :  { %15 = vst.msk [vmem:[#allocation0] sm:$0x1] %vm14_vm1, %v13_v3  }
  0x84   :  { %v20_v4 = vld [vmem:[#allocation0] sm:$0x1] }
  0x85   :  { %23 = vst [vmem:[%s43_s1] sm:$0x1] %v20_v4 }

// kernel: transformer_clm_forward.1
= control target key start
LH: loop header
LB: loop body
LE: loop exit
PB: predicated region body
PF: predicated region fallthrough
CT: control target
= control target key end

     0   :  { %v3376_v0 = vmov 1   ;;  %v3377_v1 = vmov 0   ;;  %vm98_vm0 = vcmask 1043456   ;;  %v3378_v5 = vmov 0.0   ;;  %s3380_s27 = smov 88   ;;  %s3381_s28 = smov 96   ;;  %s4084_s0 = inlined_call_operand.vmem [shape: s32[16,2], index: 0, kind: input, shape index: {}]   ;;  %s4085_s2 = inlined_call_operand.vmem [shape: bf16[72,32], index: 2, kind: input, shape index: {}]   ;;  %s4086_s3 = inlined_call_operand.vmem [shape: bf16[2,32,128], index: 3, kind: input, shape index: {}]   ;;  %s4087_s7 = inlined_call_operand.vmem [shape: f32[2,8,128], index: 7, kind: input, shape index: {}]   ;;  %s4088_s1 = inlined_call_operand.vmem [shape: f32[2,8,8], index: 1, kind: input, shape index: {}]   ;;  %s4089_s4 = inlined_call_operand.vmem [shape: bf16[2,32,32], index: 4, kind: input, shape index: {}]   ;;  %s4090_s5 = inlined_call_operand.vmem [shape: bf16[2,32,64], index: 5, kind: input, shape index: {}]   ;;  %s4091_s6 = inlined_call_operand.vmem [shape: bf16[2,64,32], index: 6, kind: input, shape index: {}]   ;;  %s4092_s8 = inlined_call_operand.vmem [shape: bf16[32,64], index: 8, kind: input, shape index: {}]   ;;  %s4093_s9 = inlined_call_operand.vmem [shape: f32[8,128], index: 9, kind: output, shape index: {}]  }
   0x1   :  { %3265 = vset.pattern.permute.xlu1 %v3376_v0  ;;  %3264 = vset.pattern.permute.xlu0 %v3377_v1  ;;  %v33_v2 = vld [vmem:[%s4084_s0] sm:$0xff]  ;;  %v34_v4 = vld [vmem:[%s4084_s0 + $0x8] sm:$0xff]  ;;  %v3268_v7 = vld [vmem:[%s4085_s2 + $0x18] sm:$0xff]   ;;  %vm3379_vm1 = vmmov 0   ;;  %v35_v11 = vlaneseq  ;;  %vm94_vm8 = vcmask 588800   ;;  %vm176_vm9 = vcmask 261120  }
   0x2   :  { %46 = vperm.xlu1 %3265, %v33_v2   ;;  %38 = vperm.xlu0 %3264, %v33_v2   ;;  %v3267_v3 = vld [vmem:[%s4085_s2 + $0x20] ss:$0 sps:$4 sm:$0xff]   ;;  %v3269_v8 = vld [vmem:[%s4085_s2 + $0x10] sm:$0xff]   ;;  %v3270_v9 = vld [vmem:[%s4085_s2 + $0x8] sm:$0xff]   ;;  %s3382_s29 = smov 80   ;;  %s3383_s30 = smov 120  }
   0x3   :  { %2952 = vmatprep.subr.bf16.mxu0 %v3378_v5  ;;  %2966 = vmatprep.subr.bf16.mxu1 %v3378_v5  ;;  %v100_v6 = vsel %vm98_vm0, %v3267_v3, 0  ;;  %v3271_v10 = vld [vmem:[%s4085_s2] sm:$0xff]   ;;  %v36_v12 = vand.u32 127, %v35_v11  ;;  %v3272_v20 = vld [vmem:[%s4086_s3 + $0x8] sm:$0xff]   ;;  %v3498_v27 = vshrl.u32 %v35_v11, 7  ;;  %s3384_s10 = smov 72  }
   0x4   :  { %2953 = vmatpush3.bf16.msra.mxu0 %v100_v6  ;;  %2962 = vmatprep.mubr.msk.bf16.mxu0 %vm3379_vm1, %v3378_v5  ;;  %v3273_v21 = vld [vmem:[%s4086_s3] sm:$0xff]   ;;  %s3385_s11 = smov 112   ;;  %s3386_s12 = smov 104   ;;  %vm225_vm10 = vcmask 64512   ;;  %vm439_vm11 = vcmask 130112   ;;  %vm551_vm12 = vcmask 195712  }
   0x5   :  { %2954 = vmatprep.subr.bf16.mxu0 %v3378_v5  ;;  %2970 = vmatprep.mubr.msk.bf16.mxu1 %vm3379_vm1, %v3378_v5  ;;  %v162_v28 = vsub.s32 0, %v3498_v27  ;;  %v3504_v29 = vld [vmem:[%s4087_s7] sm:$0xff]  ;;  %s3387_s13 = smov 56   ;;  %s3388_s14 = smov 64   ;;  %vm663_vm13 = vcmask 261312   ;;  %vm1313_vm14 = vcmask 523264  }
   0x6   :  { %49 = vperm.xlu1 %3265, %v34_v4   ;;  %41 = vperm.xlu0 %3264, %v34_v4   ;;  %v3592_v63 = vld [vmem:[%s4088_s1] sm:$0xff]  ;;  %s3389_s0 = smov 40   ;;  %s3390_s17 = smov 48   ;;  %vm2750_vm15 = vcmask 1048064  }
   0x7   :  { %2967 = vmatpush3.bf16.msra.mxu1 %v3272_v20  ;;  %v163_v30 = vrot.slane %v3504_v29, %v162_v28  ;;  %s3391_s20 = smov 8   ;;  %s3392_s21 = smov 16  }
   0x8   :  { %2955 = vmatpush3.bf16.msra.mxu0 %v3268_v7  ;;  %2968 = vmatprep.subr.bf16.mxu1 %v3378_v5  ;;  %s3393_s2 = smov 24  }
   0x9   :  { %2956 = vmatprep.subr.bf16.mxu0 %v3378_v5 }
   0xa   :  { %3266 = vset.pattern.permute.xlu0 %v3376_v0 }
   0xb   :  { %2969 = vmatpush3.bf16.msra.mxu1 %v3273_v21 }
   0xc   :  { %2957 = vmatpush3.bf16.msra.mxu0 %v3269_v8  ;;  %2974 = vmatprep.subr.bf16.mxu1 %v3378_v5 }
   0xd   :  { %2958 = vmatprep.subr.bf16.mxu0 %v3378_v5 }
  0x10   :  { %2959 = vmatpush3.bf16.msra.mxu0 %v3270_v9 }
  0x11   :  { %2960 = vmatprep.subr.bf16.mxu0 %v3378_v5 }
  0x14   :  { %2961 = vmatpush3.bf16.msra.mxu0 %v3271_v10 }
  0x15   :  { %2986 = vmatprep.subr.bf16.mxu0 %v3378_v5 }
  0x7d   :  { %v47_v13 = vpop.permute.xlu1 %46  ;;  %v39_v14 = vpop.permute.xlu0 %38 }
  0x7e   :  { %vm51_vm2 = vcmp.eq.s32.totalorder %v36_v12, %v47_v13  ;;  %vm43_vm3 = vcmp.eq.s32.totalorder %v36_v12, %v39_v14 }
  0x7f   :  { %vm53_vm4 = vmor %vm43_vm3, %vm51_vm2 }
  0x80   :  { %v55_v17 = vsel %vm53_vm4, 1.0, %v3378_v5 }
  0x81   :  { %v50_v15 = vpop.permute.xlu1 %49  ;;  %v42_v16 = vpop.permute.xlu0 %41 }
  0x82   :  { %vm52_vm5 = vcmp.eq.s32.totalorder %v36_v12, %v50_v15  ;;  %vm44_vm6 = vcmp.eq.s32.totalorder %v36_v12, %v42_v16 }
  0x83   :  { %vm54_vm7 = vmor %vm44_vm6, %vm52_vm5 }
  0x84   :  { %v56_v18 = vsel %vm54_vm7, 1.0, %v3378_v5 }
  0x85   :  { %v57_v19 = vpack.c.bf16 %v56_v18, %v55_v17 }
  0x87   :  { %2963 = vmatmul.mubr.msk.bf16.vlgmr.msra.gmra.mxu0 %vm94_vm8, %v57_v19 }
  0x88   :  { %2988 = vmatprep.mubr.msk.bf16.mxu0 %vm3379_vm1, %v3378_v5 }
 0x147   :  { %v3489_v22 = vpop.f32.mrf.mxu0 }
 0x149   :  { %v2964_v23 = vpop.f32.mrf.mxu0 }
 0x14b   :  { %v3491_v24 = vpop.f32.mrf.mxu0 }
 0x14c   :  { %v159_v25 = vpack.c.bf16 %v3491_v24, %v3489_v22 }
 0x14d   :  { %v2965_v26 = vpop.f32.mrf.mxu0 }
 0x14e   :  { %2971 = vmatmul.mubr.msk.bf16.vlgmr.msra.gmra.mxu1 %vm176_vm9, %v159_v25 }
 0x14f   :  { %2976 = vmatprep.mubr.msk.bf16.mxu1 %vm3379_vm1, %v3378_v5 }
 0x20e   :  { %v214_v31 = vpop.f32.mrf.mxu1 }
 0x20f   :  { %v215_v32 = vadd.f32 %v214_v31, %v163_v30 }
 0x210   :  { %v2972_v33 = vpop.f32.mrf.mxu1 }
 0x211   :  { %v3509_v34 = vpack.c.bf16 %v215_v32, %v215_v32 }
 0x212   :  { %v217_v35 = vpop.f32.mrf.mxu1 }
 0x213   :  { %331 = vrot.lane.b32.xlu1 %v3509_v34, %s3380_s27  ;;  %223 = vrot.lane.b32.xlu0 %v3509_v34, %s3381_s28  ;;  %v218_v37 = vadd.f32 %v217_v35, %v163_v30 }
 0x214   :  { %v2973_v36 = vpop.f32.mrf.mxu1 }
 0x215   :  { %v3523_v38 = vpack.c.bf16 %v218_v37, %v218_v37 }
 0x217   :  { %443 = vrot.lane.b32.xlu1 %v3509_v34, %s3382_s29  ;;  %329 = vrot.lane.b32.xlu0 %v3509_v34, %s3383_s30 }
 0x21b   :  { %555 = vrot.lane.b32.xlu1 %v3509_v34, %s3384_s10  ;;  %441 = vrot.lane.b32.xlu0 %v3509_v34, %s3385_s11 }
 0x21f   :  { %553 = vrot.lane.b32.xlu0 %v3509_v34, %s3386_s12  ;;  %667 = vrot.lane.b32.xlu1 %v3523_v38, %s3381_s28 }
 0x223   :  { %774 = vrot.lane.b32.xlu0 %v3523_v38, %s3380_s27  ;;  %772 = vrot.lane.b32.xlu1 %v3523_v38, %s3383_s30 }
 0x227   :  { %885 = vrot.lane.b32.xlu0 %v3523_v38, %s3382_s29  ;;  %883 = vrot.lane.b32.xlu1 %v3523_v38, %s3385_s11 }
 0x22b   :  { %996 = vrot.lane.b32.xlu0 %v3523_v38, %s3384_s10  ;;  %994 = vrot.lane.b32.xlu1 %v3523_v38, %s3386_s12 }
 0x22f   :  { %387 = vrot.lane.b32.xlu0 %v3509_v34, %s3387_s13  ;;  %280 = vrot.lane.b32.xlu1 %v3509_v34, %s3388_s14 }
 0x285   :  { %v332_v39 = vpop.permute.xlu1 %331  ;;  %v224_v40 = vpop.permute.xlu0 %223 }
 0x286   :  { %v337_v41 = vsel %vm225_vm10, %v332_v39, 0  ;;  %v230_v42 = vsel %vm225_vm10, %v224_v40, 0 }
 0x287   :  { %2975 = vmatpush3.bf16.xpose.msra.mxu1 %v230_v42  ;;  %2987 = vmatpush3.bf16.xpose.msra.mxu0 %v337_v41 }
 0x288   :  { %2998 = vmatprep.subr.bf16.mxu0 %v3378_v5  ;;  %2980 = vmatprep.subr.bf16.mxu1 %v3378_v5 }
 0x289   :  { %v444_v43 = vpop.permute.xlu1 %443  ;;  %v330_v44 = vpop.permute.xlu0 %329 }
 0x28a   :  { %v449_v46 = vsel %vm225_vm10, %v444_v43, 0 }
 0x28d   :  { %v556_v45 = vpop.permute.xlu1 %555  ;;  %v442_v48 = vpop.permute.xlu0 %441 }
 0x28e   :  { %2977 = vmatmul.mubr.msk.bf16.vlgmr.msra.gmra.mxu1 %vm225_vm10, %v3509_v34  ;;  %2989 = vmatmul.mubr.msk.bf16.vlgmr.msra.gmra.mxu0 %vm225_vm10, %v330_v44  ;;  %v561_v50 = vsel %vm225_vm10, %v556_v45, 0  ;;  %v3612_v45 = vld [vmem:[%s4088_s1 + $0x8] sm:$0xff] }
 0x28f   :  { %2999 = vmatpush3.bf16.xpose.msra.mxu0 %v449_v46  ;;  %3000 = vmatprep.mubr.msk.bf16.mxu0 %vm3379_vm1, %v3378_v5 }
 0x290   :  { %3010 = vmatprep.subr.bf16.mxu0 %v3378_v5  ;;  %2982 = vmatprep.mubr.msk.bf16.mxu1 %vm3379_vm1, %v3378_v5 }
 0x291   :  { %v668_v47 = vpop.permute.xlu1 %667  ;;  %v554_v52 = vpop.permute.xlu0 %553 }
 0x292   :  { %v673_v54 = vsel %vm225_vm10, %v668_v47, 0 }
 0x295   :  { %v773_v49 = vpop.permute.xlu1 %772  ;;  %v775_v57 = vpop.permute.xlu0 %774 }
 0x296   :  { %3001 = vmatmul.mubr.msk.bf16.vlgmr.msra.gmra.mxu0 %vm225_vm10, %v442_v48  ;;  %v780_v58 = vsel %vm225_vm10, %v775_v57, 0 }
 0x297   :  { %3011 = vmatpush3.bf16.xpose.msra.mxu0 %v561_v50  ;;  %3012 = vmatprep.mubr.msk.bf16.mxu0 %vm3379_vm1, %v3378_v5 }
 0x298   :  { %3022 = vmatprep.subr.bf16.mxu0 %v3378_v5 }
 0x299   :  { %v884_v51 = vpop.permute.xlu1 %883  ;;  %v886_v59 = vpop.permute.xlu0 %885 }
 0x29a   :  { %v891_v60 = vsel %vm225_vm10, %v886_v59, 0 }
 0x29d   :  { %v995_v53 = vpop.permute.xlu1 %994  ;;  %v997_v61 = vpop.permute.xlu0 %996 }
 0x29e   :  { %3013 = vmatmul.mubr.msk.bf16.vlgmr.msra.gmra.mxu0 %vm225_vm10, %v554_v52  ;;  %v1002_v62 = vsel %vm225_vm10, %v997_v61, 0 }
 0x29f   :  { %3023 = vmatpush3.bf16.xpose.msra.mxu0 %v673_v54  ;;  %3024 = vmatprep.mubr.msk.bf16.mxu0 %vm3379_vm1, %v3378_v5 }
 0x2a0   :  { %3034 = vmatprep.subr.bf16.mxu0 %v3378_v5 }
 0x2a1   :  { %v281_v55 = vpop.permute.xlu1 %280 }
 0x2a2   :  { %v286_v56 = vsel %vm98_vm0, %v281_v55, 0 }
 0x2a3   :  { %2981 = vmatpush3.bf16.msra.mxu1 %v286_v56 }
 0x2a4   :  { %2992 = vmatprep.subr.bf16.mxu1 %v3378_v5 }
 0x2a6   :  { %3025 = vmatmul.mubr.msk.bf16.vlgmr.msra.gmra.mxu0 %vm225_vm10, %v3523_v38 }
 0x2a7   :  { %3035 = vmatpush3.bf16.xpose.msra.mxu0 %v780_v58  ;;  %3036 = vmatprep.mubr.msk.bf16.mxu0 %vm3379_vm1, %v3378_v5 }
 0x2a8   :  { %3046 = vmatprep.subr.bf16.mxu0 %v3378_v5 }
 0x2ae   :  { %3037 = vmatmul.mubr.msk.bf16.vlgmr.msra.gmra.mxu0 %vm225_vm10, %v773_v49 }
 0x2af   :  { %3047 = vmatpush3.bf16.xpose.msra.mxu0 %v891_v60  ;;  %3048 = vmatprep.mubr.msk.bf16.mxu0 %vm3379_vm1, %v3378_v5 }
 0x2b0   :  { %3058 = vmatprep.subr.bf16.mxu0 %v3378_v5 }
 0x2b6   :  { %3049 = vmatmul.mubr.msk.bf16.vlgmr.msra.gmra.mxu0 %vm225_vm10, %v884_v51 }
 0x2b7   :  { %3059 = vmatpush3.bf16.xpose.msra.mxu0 %v1002_v62  ;;  %3060 = vmatprep.mubr.msk.bf16.mxu0 %vm3379_vm1, %v3378_v5 }
 0x2b8   :  { %3070 = vmatprep.subr.bf16.mxu0 %v3378_v5 }
 0x2be   :  { %3061 = vmatmul.mubr.msk.bf16.vlgmr.msra.gmra.mxu0 %vm225_vm10, %v995_v53 }
 0x2bf   :  { %3074 = vmatprep.mubr.msk.bf16.mxu0 %vm3379_vm1, %v3378_v5 }
 0x34e   :  { %v266_v0 = vpop.f32.mrf.mxu1  ;;  %v373_v1 = vpop.f32.mrf.mxu0 }
 0x34f   :  { %v267_v2 = vadd.f32 %v266_v0, %v3592_v63  ;;  %v374_v3 = vadd.f32 %v373_v1, %v3592_v63 }
 0x350   :  { %v2978_v4 = vpop.f32.mrf.mxu1  ;;  %v2990_v6 = vpop.f32.mrf.mxu0 }
 0x351   :  { %v272_v7 = vmul.f32 1.442695, %v267_v2  ;;  %v379_v8 = vmul.f32 1.442695, %v374_v3 }
 0x352   :  { %v269_v9 = vpop.f32.mrf.mxu1  ;;  %v376_v10 = vpop.f32.mrf.mxu0 }
 0x353   :  { %3294 = vpow2.f32 %v272_v7  ;;  %v388_v10 = vpop.permute.xlu0 %387 }
 0x354   :  { %3296 = vpow2.f32 %v379_v8  ;;  %v2979_v11 = vpop.f32.mrf.mxu1  ;;  %v2991_v12 = vpop.f32.mrf.mxu0 }
 0x356   :  { %v485_v13 = vpop.f32.mrf.mxu0 }
 0x357   :  { %v486_v44 = vadd.f32 %v485_v13, %v3592_v63 }
 0x358   :  { %v3002_v14 = vpop.f32.mrf.mxu0 }
 0x359   :  { %v491_v49 = vmul.f32 1.442695, %v486_v44 }
 0x35a   :  { %v488_v15 = vpop.f32.mrf.mxu0 }
 0x35b   :  { %3298 = vpow2.f32 %v491_v49 }
 0x35c   :  { %v3003_v16 = vpop.f32.mrf.mxu0 }
 0x35e   :  { %v597_v17 = vpop.f32.mrf.mxu0 }
 0x35f   :  { %v598_v50 = vadd.f32 %v597_v17, %v3592_v63  ;;  %v393_v17 = vsel %vm98_vm0, %v388_v10, 0 }
 0x360   :  { %v3596_v18 = vpop.eup %3294  ;;  %v3014_v19 = vpop.f32.mrf.mxu0 }
 0x361   :  { %v3598_v20 = vpop.eup %3296  ;;  %v274_v21 = vsel %vm225_vm10, %v3596_v18, 0.0  ;;  %v603_v53 = vmul.f32 1.442695, %v598_v50 }
 0x362   :  { %275 = vadd.xlane.f32.xlu0 %v274_v21  ;;  %v381_v23 = vsel %vm225_vm10, %v3598_v20, 0.0  ;;  %v600_v25 = vpop.f32.mrf.mxu0 }
 0x363   :  { %382 = vadd.xlane.f32.xlu1 %v381_v23 }
 0x364   :  { %v3015_v26 = vpop.f32.mrf.mxu0 }
 0x366   :  { %v709_v30 = vpop.f32.mrf.mxu0 }
 0x367   :  { %v710_v54 = vadd.f32 %v3612_v45, %v709_v30 }
 0x368   :  { %v3026_v31 = vpop.f32.mrf.mxu0  ;;  %v3299_v60 = vpop.eup %3298 }
 0x369   :  { %v715_v55 = vmul.f32 1.442695, %v710_v54  ;;  %v493_v62 = vsel %vm225_vm10, %v3299_v60, 0.0 }
 0x36a   :  { %v712_v32 = vpop.f32.mrf.mxu0 }
 0x36c   :  { %v3027_v33 = vpop.f32.mrf.mxu0 }
 0x36e   :  { %v816_v35 = vpop.f32.mrf.mxu0 }
 0x36f   :  { %v817_v47 = vadd.f32 %v3612_v45, %v816_v35 }
 0x370   :  { %v3038_v36 = vpop.f32.mrf.mxu0 }
 0x371   :  { %v822_v52 = vmul.f32 1.442695, %v817_v47 }
 0x372   :  { %v819_v37 = vpop.f32.mrf.mxu0 }
 0x373   :  { %3300 = vpow2.f32 %v822_v52 }
 0x374   :  { %611 = vrot.lane.b32.xlu1 %v3509_v34, %s3389_s0  ;;  %v3039_v39 = vpop.f32.mrf.mxu0  ;;  %3302 = vpow2.f32 %v603_v53 }
 0x375   :  { %3304 = vpow2.f32 %v715_v55 }
 0x376   :  { %v927_v40 = vpop.f32.mrf.mxu0 }
 0x377   :  { %v928_v56 = vadd.f32 %v3612_v45, %v927_v40 }
 0x378   :  { %499 = vrot.lane.b32.xlu0 %v3509_v34, %s3390_s17  ;;  %v3050_v41 = vpop.f32.mrf.mxu0 }
 0x379   :  { %v933_v57 = vmul.f32 1.442695, %v928_v56 }
 0x37a   :  { %v930_v42 = vpop.f32.mrf.mxu0 }
 0x37b   :  { %3306 = vpow2.f32 %v933_v57 }
 0x37c   :  { %v3051_v43 = vpop.f32.mrf.mxu0 }
 0x37e   :  { %v1038_v46 = vpop.f32.mrf.mxu0 }
 0x37f   :  { %v1039_v58 = vadd.f32 %v3612_v45, %v1038_v46 }
 0x380   :  { %v3062_v48 = vpop.f32.mrf.mxu0  ;;  %v3619_v61 = vpop.eup %3300 }
 0x381   :  { %v1044_v59 = vmul.f32 1.442695, %v1039_v58  ;;  %v3303_v0 = vpop.eup %3302  ;;  %v824_v1 = vsel %vm225_vm10, %v3619_v61, 0.0 }
 0x382   :  { %v1041_v51 = vpop.f32.mrf.mxu0  ;;  %v605_v2 = vsel %vm225_vm10, %v3303_v0, 0.0  ;;  %v3625_v3 = vpop.eup %3304 }
 0x383   :  { %3308 = vpow2.f32 %v1044_v59  ;;  %v717_v4 = vsel %vm225_vm10, %v3625_v3, 0.0 }
 0x384   :  { %v3063_v34 = vpop.f32.mrf.mxu0 }
 0x388   :  { %v3629_v6 = vpop.eup %3306 }
 0x389   :  { %v935_v7 = vsel %vm225_vm10, %v3629_v6, 0.0 }
 0x390   :  { %v3633_v8 = vpop.eup %3308 }
 0x391   :  { %v1046_v9 = vsel %vm225_vm10, %v3633_v8, 0.0 }
 0x397   :  { %494 = vadd.xlane.f32.xlu0 %v493_v62 }
 0x398   :  { %825 = vadd.xlane.f32.xlu1 %v824_v1 }
 0x39b   :  { %606 = vadd.xlane.f32.xlu0 %v605_v2 }
 0x39f   :  { %718 = vadd.xlane.f32.xlu0 %v717_v4 }
 0x3a3   :  { %936 = vadd.xlane.f32.xlu0 %v935_v7 }
 0x3a7   :  { %1047 = vadd.xlane.f32.xlu0 %v1046_v9 }
 0x3a9   :  { %830 = vrot.lane.b32.xlu1 %v3523_v38, %s3387_s13 }
 0x3ad   :  { %941 = vrot.lane.b32.xlu1 %v3523_v38, %s3390_s17 }
 0x3b1   :  { %1052 = vrot.lane.b32.xlu1 %v3523_v38, %s3389_s0 }
 0x3bd   :  { %723 = vrot.lane.b32.xlu0 %v3523_v38, %s3388_s14 }
 0x3eb   :  { %v276_v11 = vpop.xlane.xlu0 %275 }
 0x3ec   :  { %3310 = vrcp.f32 %v276_v11  ;;  %v383_v12 = vpop.xlane.xlu1 %382 }
 0x3ed   :  { %3312 = vrcp.f32 %v383_v12 }
 0x3ef   :  { %v500_v19 = vpop.permute.xlu0 %499 }
 0x3f0   :  { %v505_v23 = vsel %vm98_vm0, %v500_v19, 0  ;;  %v612_v31 = vpop.permute.xlu1 %611 }
 0x3f1   :  { %v617_v39 = vsel %vm98_vm0, %v612_v31, 0 }
 0x3f9   :  { %v3311_v13 = vpop.eup %3310 }
 0x3fa   :  { %v278_v14 = vmul.f32 %v3311_v13, %v3596_v18  ;;  %v3313_v16 = vpop.eup %3312 }
 0x3fb   :  { %v385_v38 = vmul.f32 %v3313_v16, %v3598_v20 }
 0x3fc   :  { %v279_v15 = vpack.c.bf16 %v278_v14, %v278_v14 }
 0x3fd   :  { %v386_v21 = vpack.c.bf16 %v385_v38, %v385_v38 }
 0x3fe   :  { %2983 = vmatmul.mubr.msk.bf16.vlgmr.msra.gmra.mxu1 %vm225_vm10, %v279_v15 }
 0x3ff   :  { %2993 = vmatpush3.bf16.msra.mxu1 %v393_v17  ;;  %2994 = vmatprep.mubr.msk.bf16.mxu1 %vm3379_vm1, %v3378_v5 }
 0x400   :  { %3004 = vmatprep.subr.bf16.mxu1 %v3378_v5 }
 0x406   :  { %2995 = vmatmul.mubr.msk.bf16.vlgmr.msra.gmra.mxu1 %vm225_vm10, %v386_v21 }
 0x407   :  { %3005 = vmatpush3.bf16.msra.mxu1 %v505_v23  ;;  %3006 = vmatprep.mubr.msk.bf16.mxu1 %vm3379_vm1, %v3378_v5 }
 0x408   :  { %3016 = vmatprep.subr.bf16.mxu1 %v3378_v5 }
 0x420   :  { %v495_v18 = vpop.xlane.xlu0 %494 }
 0x421   :  { %3314 = vrcp.f32 %v495_v18  ;;  %v826_v36 = vpop.xlane.xlu1 %825 }
 0x424   :  { %v607_v25 = vpop.xlane.xlu0 %606 }
 0x425   :  { %3316 = vrcp.f32 %v607_v25  ;;  %v831_v47 = vpop.permute.xlu1 %830  ;;  %v3274_v25 = vld [vmem:[%s4089_s4 + $0x8] sm:$0xff]  }
 0x426   :  { %v836_v50 = vsel %vm98_vm0, %v831_v47, 0  ;;  %3071 = vmatpush3.bf16.msra.mxu0 %v3274_v25 }
 0x427   :  { %3072 = vmatprep.subr.bf16.mxu0 %v3378_v5 }
 0x428   :  { %v719_v26 = vpop.xlane.xlu0 %718 }
 0x429   :  { %3318 = vrcp.f32 %v719_v26  ;;  %v942_v52 = vpop.permute.xlu1 %941 }
 0x42a   :  { %3320 = vrcp.f32 %v826_v36  ;;  %v947_v54 = vsel %vm98_vm0, %v942_v52, 0 }
 0x42c   :  { %v937_v30 = vpop.xlane.xlu0 %936 }
 0x42d   :  { %3322 = vrcp.f32 %v937_v30  ;;  %v1053_v56 = vpop.permute.xlu1 %1052  ;;  %v3275_v30 = vld [vmem:[%s4089_s4] sm:$0xff]  }
 0x42e   :  { %v3315_v20 = vpop.eup %3314  ;;  %v1058_v59 = vsel %vm98_vm0, %v1053_v56, 0  ;;  %3073 = vmatpush3.bf16.msra.mxu0 %v3275_v30 }
 0x42f   :  { %v497_v32 = vmul.f32 %v3315_v20, %v3299_v60  ;;  %3086 = vmatprep.subr.bf16.mxu0 %v3378_v5 }
 0x430   :  { %v1048_v37 = vpop.xlane.xlu0 %1047 }
 0x431   :  { %v498_v33 = vpack.c.bf16 %v497_v32, %v497_v32  ;;  %3324 = vrcp.f32 %v1048_v37 }
 0x432   :  { %v3317_v35 = vpop.eup %3316 }
 0x433   :  { %3007 = vmatmul.mubr.msk.bf16.vlgmr.msra.gmra.mxu1 %vm225_vm10, %v498_v33  ;;  %v609_v40 = vmul.f32 %v3317_v35, %v3303_v0 }
 0x434   :  { %3017 = vmatpush3.bf16.msra.mxu1 %v617_v39  ;;  %3018 = vmatprep.mubr.msk.bf16.mxu1 %vm3379_vm1, %v3378_v5  ;;  %v724_v41 = vpop.permute.xlu0 %723 }
 0x435   :  { %3028 = vmatprep.subr.bf16.mxu1 %v3378_v5  ;;  %v610_v42 = vpack.c.bf16 %v609_v40, %v609_v40  ;;  %v729_v44 = vsel %vm98_vm0, %v724_v41, 0 }
 0x436   :  { %v3319_v43 = vpop.eup %3318 }
 0x437   :  { %v721_v46 = vmul.f32 %v3319_v43, %v3625_v3  ;;  %v3321_v49 = vpop.eup %3320 }
 0x438   :  { %v828_v51 = vmul.f32 %v3321_v49, %v3619_v61 }
 0x439   :  { %v722_v48 = vpack.c.bf16 %v721_v46, %v721_v46 }
 0x43a   :  { %v829_v34 = vpack.c.bf16 %v828_v51, %v828_v51  ;;  %v3323_v53 = vpop.eup %3322 }
 0x43b   :  { %3019 = vmatmul.mubr.msk.bf16.vlgmr.msra.gmra.mxu1 %vm225_vm10, %v610_v42  ;;  %v939_v55 = vmul.f32 %v3323_v53, %v3629_v6 }
 0x43c   :  { %3029 = vmatpush3.bf16.msra.mxu1 %v729_v44  ;;  %3030 = vmatprep.mubr.msk.bf16.mxu1 %vm3379_vm1, %v3378_v5 }
 0x43d   :  { %3040 = vmatprep.subr.bf16.mxu1 %v3378_v5  ;;  %v940_v57 = vpack.c.bf16 %v939_v55, %v939_v55 }
 0x43e   :  { %v3325_v58 = vpop.eup %3324 }
 0x43f   :  { %v1050_v60 = vmul.f32 %v3325_v58, %v3633_v8 }
 0x441   :  { %v1051_v61 = vpack.c.bf16 %v1050_v60, %v1050_v60 }
 0x443   :  { %3031 = vmatmul.mubr.msk.bf16.vlgmr.msra.gmra.mxu1 %vm225_vm10, %v722_v48 }
 0x444   :  { %3041 = vmatpush3.bf16.msra.mxu1 %v836_v50  ;;  %3042 = vmatprep.mubr.msk.bf16.mxu1 %vm3379_vm1, %v3378_v5  ;;  %v1110_v50 = vsub.s32 1, %v3498_v27 }
 0x445   :  { %3052 = vmatprep.subr.bf16.mxu1 %v3378_v5 }
 0x446   :  { %v1111_v51 = vrot.slane %v3504_v29, %v1110_v50 }
 0x44b   :  { %3043 = vmatmul.mubr.msk.bf16.vlgmr.msra.gmra.mxu1 %vm225_vm10, %v829_v34 }
 0x44c   :  { %3053 = vmatpush3.bf16.msra.mxu1 %v947_v54  ;;  %3054 = vmatprep.mubr.msk.bf16.mxu1 %vm3379_vm1, %v3378_v5 }
 0x44d   :  { %3064 = vmatprep.subr.bf16.mxu1 %v3378_v5 }
 0x453   :  { %3055 = vmatmul.mubr.msk.bf16.vlgmr.msra.gmra.mxu1 %vm225_vm10, %v940_v57 }
 0x454   :  { %3065 = vmatpush3.bf16.msra.mxu1 %v1058_v59  ;;  %3066 = vmatprep.mubr.msk.bf16.mxu1 %vm3379_vm1, %v3378_v5 }
 0x455   :  { %3078 = vmatprep.subr.bf16.mxu1 %v3378_v5 }
 0x45b   :  { %3067 = vmatmul.mubr.msk.bf16.vlgmr.msra.gmra.mxu1 %vm225_vm10, %v1051_v61 }
 0x45c   :  { %3082 = vmatprep.mubr.msk.bf16.mxu1 %vm3379_vm1, %v3378_v5 }
 0x4be   :  { %v322_v62 = vpop.f32.mrf.mxu1 }
 0x4bf   :  { %328 = vst.msk [vmem:[#allocation2] sm:$0xff] %vm225_vm10, %v322_v62 }
 0x4c0   :  { %v2984_v0 = vpop.f32.mrf.mxu1 }
 0x4c2   :  { %v325_v1 = vpop.f32.mrf.mxu1 }
 0x4c4   :  { %v2985_v2 = vpop.f32.mrf.mxu1 }
 0x4c6   :  { %v429_v3 = vpop.f32.mrf.mxu1 }
 0x4c7   :  { %436 = vrot.lane.b32.xlu1 %v429_v3, %s3391_s20 }
 0x4c8   :  { %v2996_v4 = vpop.f32.mrf.mxu1 }
 0x4ca   :  { %v432_v6 = vpop.f32.mrf.mxu1 }
 0x4cc   :  { %v2997_v7 = vpop.f32.mrf.mxu1 }
 0x4f3   :  { %v541_v8 = vpop.f32.mrf.mxu1 }
 0x4f4   :  { %548 = vrot.lane.b32.xlu0 %v541_v8, %s3392_s21  ;;  %v3277_v8 = vld [vmem:[%s4090_s5] sm:$0xff]  }
 0x4f5   :  { %v3008_v9 = vpop.f32.mrf.mxu1 }
 0x4f6   :  { %v3278_v9 = vld [vmem:[%s4091_s6 + $0x18] sm:$0xff]  }
 0x4f7   :  { %v544_v10 = vpop.f32.mrf.mxu1 }
 0x4f9   :  { %v3009_v11 = vpop.f32.mrf.mxu1 }
 0x4fb   :  { %v653_v12 = vpop.f32.mrf.mxu1 }
 0x4fc   :  { %660 = vrot.lane.b32.xlu0 %v653_v12, %s3393_s2 }
 0x4fd   :  { %v3020_v13 = vpop.f32.mrf.mxu1 }
 0x4ff   :  { %v656_v14 = vpop.f32.mrf.mxu1 }
 0x501   :  { %v3021_v15 = vpop.f32.mrf.mxu1 }
 0x503   :  { %v765_v16 = vpop.f32.mrf.mxu1 }
 0x504   :  { %771 = vst.msk [vmem:[#allocation2 + $0x8] sm:$0xff] %vm225_vm10, %v765_v16  ;;  %v1199_v16 = vsub.s32 3, %v3498_v27 }
 0x505   :  { %v3032_v17 = vpop.f32.mrf.mxu1 }
 0x507   :  { %v768_v38 = vpop.f32.mrf.mxu1 }
 0x509   :  { %v3033_v19 = vpop.f32.mrf.mxu1 }
 0x50a   :  { %v1200_v19 = vrot.slane %v3504_v29, %v1199_v16 }
 0x50b   :  { %v872_v21 = vpop.f32.mrf.mxu1 }
 0x50c   :  { %879 = vrot.lane.b32.xlu1 %v872_v21, %s3391_s20  ;;  %v1205_v21 = vsub.s32 4, %v3498_v27 }
 0x50d   :  { %v3044_v23 = vpop.f32.mrf.mxu1 }
 0x50f   :  { %v875_v18 = vpop.f32.mrf.mxu1 }
 0x511   :  { %v3045_v26 = vpop.f32.mrf.mxu1 }
 0x512   :  { %v1206_v26 = vrot.slane %v3504_v29, %v1205_v21 }
 0x513   :  { %v983_v20 = vpop.f32.mrf.mxu1 }
 0x514   :  { %990 = vrot.lane.b32.xlu1 %v983_v20, %s3392_s21 }
 0x515   :  { %v3056_v31 = vpop.f32.mrf.mxu1 }
 0x517   :  { %v986_v32 = vpop.f32.mrf.mxu1 }
 0x519   :  { %v3057_v33 = vpop.f32.mrf.mxu1 }
 0x51a   :  { %v3279_v33 = vld [vmem:[%s4091_s6 + $0x10] sm:$0xff]  }
 0x51b   :  { %v1094_v35 = vpop.f32.mrf.mxu1 }
 0x51c   :  { %1101 = vrot.lane.b32.xlu1 %v1094_v35, %s3393_s2  ;;  %v3280_v35 = vld [vmem:[%s4091_s6 + $0x8] sm:$0xff]  }
 0x51d   :  { %v3068_v36 = vpop.f32.mrf.mxu1 }
 0x51e   :  { %v3281_v36 = vld [vmem:[%s4091_s6] sm:$0xff]  }
 0x51f   :  { %v1097_v37 = vpop.f32.mrf.mxu1 }
 0x520   :  { %v1216_v37 = vsub.s32 2, %v3498_v27 }
 0x521   :  { %v3069_v39 = vpop.f32.mrf.mxu1 }
 0x522   :  { %v1217_v39 = vrot.slane %v3504_v29, %v1216_v37 }
 0x539   :  { %v437_v40 = vpop.permute.xlu1 %436 }
 0x53a   :  { %440 = vst.msk [vmem:[#allocation2] sm:$0xff] %vm439_vm11, %v437_v40 }
 0x566   :  { %v549_v41 = vpop.permute.xlu0 %548 }
 0x567   :  { %552 = vst.msk [vmem:[#allocation2] sm:$0xff] %vm551_vm12, %v549_v41 }
 0x56e   :  { %v661_v42 = vpop.permute.xlu0 %660 }
 0x56f   :  { %664 = vst.msk [vmem:[#allocation2] sm:$0xff] %vm663_vm13, %v661_v42 }
 0x576   :  { %v1105_v47 = vld [vmem:[#allocation2] sm:$0xff] }
 0x57e   :  { %v880_v43 = vpop.permute.xlu1 %879 }
 0x57f   :  { %882 = vst.msk [vmem:[#allocation2 + $0x8] sm:$0xff] %vm439_vm11, %v880_v43 }
 0x586   :  { %v991_v44 = vpop.permute.xlu1 %990 }
 0x587   :  { %993 = vst.msk [vmem:[#allocation2 + $0x8] sm:$0xff] %vm551_vm12, %v991_v44 }
 0x58e   :  { %v1102_v46 = vpop.permute.xlu1 %1101 }
 0x58f   :  { %1104 = vst.msk [vmem:[#allocation2 + $0x8] sm:$0xff] %vm663_vm13, %v1102_v46 }
 0x596   :  { %v1106_v48 = vld [vmem:[#allocation2 + $0x8] sm:$0xff] }
 0x597   :  { %v1107_v49 = vpack.c.bf16 %v1106_v48, %v1105_v47 }
 0x599   :  { %3075 = vmatmul.mubr.msk.bf16.vlgmr.msra.gmra.mxu0 %vm176_vm9, %v1107_v49 }
 0x59a   :  { %3094 = vmatprep.mubr.msk.bf16.mxu0 %vm3379_vm1, %v3378_v5  ;;  %3087 = vmatpush3.bf16.msra.mxu0 %v3278_v9  ;;  %v3283_v9 = vld [vmem:[%s4086_s3 + $0x10] sm:$0xff]  }
 0x59b   :  { %3088 = vmatprep.subr.bf16.mxu0 %v3378_v5 }
 0x59e   :  { %3089 = vmatpush3.bf16.msra.mxu0 %v3279_v33 }
 0x59f   :  { %3090 = vmatprep.subr.bf16.mxu0 %v3378_v5 }
 0x5a2   :  { %3091 = vmatpush3.bf16.msra.mxu0 %v3280_v35 }
 0x5a3   :  { %3092 = vmatprep.subr.bf16.mxu0 %v3378_v5 }
 0x5a6   :  { %3093 = vmatpush3.bf16.msra.mxu0 %v3281_v36  ;;  %v3802_v36 = vld [vmem:[%s4087_s7 + $0x8] sm:$0xff] }
 0x5a7   :  { %3112 = vmatprep.subr.bf16.mxu0 %v3378_v5 }
 0x659   :  { %v1161_v52 = vpop.f32.mrf.mxu0 }
 0x65a   :  { %v1162_v34 = vadd.f32 %v1161_v52, %v1111_v51 }
 0x65b   :  { %v3076_v53 = vpop.f32.mrf.mxu0 }
 0x65c   :  { %v1168_v54 = vadd.f32 %v1162_v34, %v3489_v22 }
 0x65d   :  { %v1164_v55 = vpop.f32.mrf.mxu0 }
 0x65e   :  { %v1165_v56 = vadd.f32 %v1164_v55, %v1111_v51  ;;  %v1170_v57 = vsel %vm176_vm9, %v1168_v54, 0.0  ;;  %v1287_v51 = vsub.s32 5, %v3498_v27 }
 0x65f   :  { %1171 = vadd.xlane.f32.xlu0 %v1170_v57  ;;  %v3077_v58 = vpop.f32.mrf.mxu0 }
 0x660   :  { %v1169_v59 = vadd.f32 %v1165_v56, %v3491_v24  ;;  %v3276_v24 = vld [vmem:[%s4090_s5 + $0x8] sm:$0xff]   ;;  %v1288_v52 = vrot.slane %v3504_v29, %v1287_v51 }
 0x661   :  { %3079 = vmatpush3.bf16.msra.mxu1 %v3276_v24 }
 0x662   :  { %v1173_v60 = vsel %vm176_vm9, %v1169_v59, 0.0  ;;  %3080 = vmatprep.subr.bf16.mxu1 %v3378_v5 }
 0x663   :  { %1174 = vadd.xlane.f32.xlu1 %v1173_v60 }
 0x665   :  { %3081 = vmatpush3.bf16.msra.mxu1 %v3277_v8  ;;  %v3282_v8 = vld [vmem:[%s4086_s3 + $0x18] sm:$0xff]  }
 0x666   :  { %3098 = vmatprep.subr.bf16.mxu1 %v3378_v5 }
 0x6e8   :  { %v1172_v61 = vpop.xlane.xlu0 %1171 }
 0x6e9   :  { %v1177_v62 = vmul.f32 0.03125, %v1172_v61 }
 0x6eb   :  { %v1179_v0 = vsub.f32 %v1168_v54, %v1177_v62 }
 0x6ec   :  { %v1175_v1 = vpop.xlane.xlu1 %1174 }
 0x6ed   :  { %v1178_v2 = vmul.f32 0.03125, %v1175_v1  ;;  %v1181_v3 = vmul.f32 %v1179_v0, %v1179_v0 }
 0x6ef   :  { %v1180_v4 = vsub.f32 %v1169_v59, %v1178_v2  ;;  %v1183_v22 = vsel %vm176_vm9, %v1181_v3, 0.0 }
 0x6f0   :  { %1184 = vadd.xlane.f32.xlu0 %v1183_v22 }
 0x6f1   :  { %v1182_v6 = vmul.f32 %v1180_v4, %v1180_v4 }
 0x6f3   :  { %v1186_v7 = vsel %vm176_vm9, %v1182_v6, 0.0 }
 0x6f4   :  { %1187 = vadd.xlane.f32.xlu0 %v1186_v7 }
 0x779   :  { %v1185_v10 = vpop.xlane.xlu0 %1184 }
 0x77a   :  { %v1189_v11 = vmul.f32 0.03125, %v1185_v10 }
 0x77c   :  { %v1191_v12 = vadd.f32 1e-05, %v1189_v11 }
 0x77d   :  { %v1188_v13 = vpop.xlane.xlu0 %1187 }
 0x77e   :  { %3326 = vrsqrt.f32 %v1191_v12  ;;  %v1190_v14 = vmul.f32 0.03125, %v1188_v13 }
 0x780   :  { %v1192_v15 = vadd.f32 1e-05, %v1190_v14 }
 0x782   :  { %3328 = vrsqrt.f32 %v1192_v15 }
 0x78b   :  { %v3327_v17 = vpop.eup %3326 }
 0x78c   :  { %v1195_v38 = vmul.f32 %v3327_v17, %v1179_v0  ;;  %v1388_v17 = vsub.s32 6, %v3498_v27 }
 0x78e   :  { %v1201_v25 = vmul.f32 %v1200_v19, %v1195_v38 }
 0x78f   :  { %v3329_v23 = vpop.eup %3328 }
 0x790   :  { %v1196_v18 = vmul.f32 %v3329_v23, %v1180_v4  ;;  %v1207_v20 = vadd.f32 %v1206_v26, %v1201_v25  ;;  %v1389_v23 = vrot.slane %v3504_v29, %v1388_v17 }
 0x792   :  { %v1202_v30 = vmul.f32 %v1200_v19, %v1196_v18  ;;  %v1394_v18 = vsub.s32 7, %v3498_v27 }
 0x794   :  { %v1208_v31 = vadd.f32 %v1206_v26, %v1202_v30 }
 0x796   :  { %v1209_v32 = vpack.c.bf16 %v1208_v31, %v1207_v20 }
 0x798   :  { %3083 = vmatmul.mubr.msk.bf16.vlgmr.msra.gmra.mxu1 %vm176_vm9, %v1209_v32 }
 0x799   :  { %3102 = vmatprep.mubr.msk.bf16.mxu1 %vm3379_vm1, %v3378_v5  ;;  %3099 = vmatpush3.bf16.msra.mxu1 %v3282_v8 }
 0x79a   :  { %3100 = vmatprep.subr.bf16.mxu1 %v3378_v5 }
 0x79d   :  { %3101 = vmatpush3.bf16.msra.mxu1 %v3283_v9 }
 0x79e   :  { %3106 = vmatprep.subr.bf16.mxu1 %v3378_v5 }
 0x858   :  { %v1267_v40 = vpop.f32.mrf.mxu1 }
 0x859   :  { %v1268_v42 = vadd.f32 %v1267_v40, %v1217_v39 }
 0x85a   :  { %v3084_v41 = vpop.f32.mrf.mxu1 }
 0x85b   :  { %v1274_v47 = vmax.f32 %v1268_v42, 0.0 }
 0x85c   :  { %v1270_v43 = vpop.f32.mrf.mxu1 }
 0x85d   :  { %v1271_v44 = vadd.f32 %v1270_v43, %v1217_v39 }
 0x85e   :  { %v3085_v46 = vpop.f32.mrf.mxu1 }
 0x85f   :  { %v1275_v48 = vmax.f32 %v1271_v44, 0.0 }
 0x861   :  { %v1276_v49 = vpack.c.bf16 %v1275_v48, %v1274_v47 }
 0x863   :  { %3095 = vmatmul.mubr.msk.bf16.vlgmr.msra.gmra.mxu0 %vm1313_vm14, %v1276_v49 }
 0x864   :  { %3114 = vmatprep.mubr.msk.bf16.mxu0 %vm3379_vm1, %v3378_v5 }
 0x923   :  { %v1351_v34 = vpop.f32.mrf.mxu0 }
 0x924   :  { %v1352_v53 = vadd.f32 %v1351_v34, %v1288_v52 }
 0x925   :  { %v3096_v54 = vpop.f32.mrf.mxu0 }
 0x926   :  { %v1358_v55 = vadd.f32 %v1352_v53, %v1207_v20  ;;  %v1395_v20 = vrot.slane %v3504_v29, %v1394_v18  ;;  %v1414_v29 = vrot.slane %v3802_v36, %v162_v28 }
 0x927   :  { %v1354_v56 = vpop.f32.mrf.mxu0 }
 0x928   :  { %v1355_v57 = vadd.f32 %v1354_v56, %v1288_v52  ;;  %v1360_v58 = vsel %vm176_vm9, %v1358_v55, 0.0 }
 0x929   :  { %1361 = vadd.xlane.f32.xlu1 %v1360_v58  ;;  %v3097_v59 = vpop.f32.mrf.mxu0 }
 0x92a   :  { %v1359_v60 = vadd.f32 %v1355_v57, %v1208_v31 }
 0x92c   :  { %v1363_v61 = vsel %vm176_vm9, %v1359_v60, 0.0 }
 0x92d   :  { %1364 = vadd.xlane.f32.xlu0 %v1363_v61 }
 0x9b2   :  { %v1362_v62 = vpop.xlane.xlu1 %1361 }
 0x9b3   :  { %v1366_v0 = vmul.f32 0.03125, %v1362_v62 }
 0x9b5   :  { %v1368_v1 = vsub.f32 %v1358_v55, %v1366_v0 }
 0x9b6   :  { %v1365_v2 = vpop.xlane.xlu0 %1364 }
 0x9b7   :  { %v1367_v3 = vmul.f32 0.03125, %v1365_v2  ;;  %v1370_v4 = vmul.f32 %v1368_v1, %v1368_v1 }
 0x9b9   :  { %v1369_v22 = vsub.f32 %v1359_v60, %v1367_v3  ;;  %v1372_v6 = vsel %vm176_vm9, %v1370_v4, 0.0 }
 0x9ba   :  { %1373 = vadd.xlane.f32.xlu1 %v1372_v6 }
 0x9bb   :  { %v1371_v7 = vmul.f32 %v1369_v22, %v1369_v22 }
 0x9bd   :  { %v1375_v24 = vsel %vm176_vm9, %v1371_v7, 0.0 }
 0x9be   :  { %1376 = vadd.xlane.f32.xlu0 %v1375_v24 }
 0xa43   :  { %v1374_v10 = vpop.xlane.xlu1 %1373 }
 0xa44   :  { %v1378_v11 = vmul.f32 0.03125, %v1374_v10 }
 0xa46   :  { %v1380_v12 = vadd.f32 1e-05, %v1378_v11 }
 0xa47   :  { %v1377_v13 = vpop.xlane.xlu0 %1376 }
 0xa48   :  { %3330 = vrsqrt.f32 %v1380_v12  ;;  %v1379_v14 = vmul.f32 0.03125, %v1377_v13 }
 0xa4a   :  { %v1381_v15 = vadd.f32 1e-05, %v1379_v14 }
 0xa4c   :  { %3332 = vrsqrt.f32 %v1381_v15 }
 0xa55   :  { %v3331_v38 = vpop.eup %3330 }
 0xa56   :  { %v1384_v19 = vmul.f32 %v3331_v38, %v1368_v1 }
 0xa58   :  { %v1390_v30 = vmul.f32 %v1389_v23, %v1384_v19 }
 0xa59   :  { %v3333_v25 = vpop.eup %3332 }
 0xa5a   :  { %v1385_v26 = vmul.f32 %v3333_v25, %v1369_v22  ;;  %v3790_v32 = vadd.f32 %v1395_v20, %v1390_v30 }
 0xa5c   :  { %v1391_v31 = vmul.f32 %v1389_v23, %v1385_v26 }
 0xa5e   :  { %v3792_v33 = vadd.f32 %v1395_v20, %v1391_v31 }
 0xa60   :  { %v1410_v35 = vpack.c.bf16 %v3792_v33, %v3790_v32 }
 0xa62   :  { %3103 = vmatmul.mubr.msk.bf16.vlgmr.msra.gmra.mxu1 %vm176_vm9, %v1410_v35 }
 0xa63   :  { %3108 = vmatprep.mubr.msk.bf16.mxu1 %vm3379_vm1, %v3378_v5 }
 0xb22   :  { %v1464_v39 = vpop.f32.mrf.mxu1 }
 0xb23   :  { %v1465_v40 = vadd.f32 %v1464_v39, %v1414_v29 }
 0xb24   :  { %v3104_v41 = vpop.f32.mrf.mxu1 }
 0xb25   :  { %v3807_v42 = vpack.c.bf16 %v1465_v40, %v1465_v40 }
 0xb26   :  { %v1467_v43 = vpop.f32.mrf.mxu1 }
 0xb27   :  { %1580 = vrot.lane.b32.xlu0 %v3807_v42, %s3380_s27  ;;  %1473 = vrot.lane.b32.xlu1 %v3807_v42, %s3381_s28  ;;  %v1468_v28 = vadd.f32 %v1467_v43, %v1414_v29 }
 0xb28   :  { %v3105_v44 = vpop.f32.mrf.mxu1 }
 0xb29   :  { %v3821_v46 = vpack.c.bf16 %v1468_v28, %v1468_v28 }
 0xb2b   :  { %1689 = vrot.lane.b32.xlu0 %v3807_v42, %s3385_s11  ;;  %1578 = vrot.lane.b32.xlu1 %v3807_v42, %s3383_s30 }
 0xb2f   :  { %1800 = vrot.lane.b32.xlu0 %v3807_v42, %s3386_s12  ;;  %1691 = vrot.lane.b32.xlu1 %v3807_v42, %s3382_s29 }
 0xb33   :  { %1802 = vrot.lane.b32.xlu1 %v3807_v42, %s3384_s10  ;;  %2020 = vrot.lane.b32.xlu0 %v3821_v46, %s3380_s27 }
 0xb37   :  { %2131 = vrot.lane.b32.xlu0 %v3821_v46, %s3382_s29  ;;  %1913 = vrot.lane.b32.xlu1 %v3821_v46, %s3381_s28 }
 0xb3b   :  { %2242 = vrot.lane.b32.xlu0 %v3821_v46, %s3384_s10  ;;  %2018 = vrot.lane.b32.xlu1 %v3821_v46, %s3383_s30 }
 0xb3f   :  { %1636 = vrot.lane.b32.xlu0 %v3807_v42, %s3387_s13  ;;  %2129 = vrot.lane.b32.xlu1 %v3821_v46, %s3385_s11 }
 0xb43   :  { %2240 = vrot.lane.b32.xlu1 %v3821_v46, %s3386_s12 }
 0xb47   :  { %1529 = vrot.lane.b32.xlu1 %v3807_v42, %s3388_s14 }
 0xb99   :  { %v1474_v47 = vpop.permute.xlu1 %1473  ;;  %v1581_v52 = vpop.permute.xlu0 %1580 }
 0xb9a   :  { %v1479_v48 = vsel %vm225_vm10, %v1474_v47, 0  ;;  %v1586_v53 = vsel %vm225_vm10, %v1581_v52, 0 }
 0xb9b   :  { %3107 = vmatpush3.bf16.xpose.msra.mxu1 %v1479_v48 }
 0xb9c   :  { %3118 = vmatprep.subr.bf16.mxu1 %v3378_v5 }
 0xb9d   :  { %v1579_v49 = vpop.permute.xlu1 %1578  ;;  %v1690_v58 = vpop.permute.xlu0 %1689 }
 0xba1   :  { %v1692_v34 = vpop.permute.xlu1 %1691  ;;  %v1801_v62 = vpop.permute.xlu0 %1800 }
 0xba2   :  { %3109 = vmatmul.mubr.msk.bf16.vlgmr.msra.gmra.mxu1 %vm225_vm10, %v3807_v42  ;;  %v1697_v56 = vsel %vm225_vm10, %v1692_v34, 0 }
 0xba3   :  { %3119 = vmatpush3.bf16.xpose.msra.mxu1 %v1586_v53  ;;  %3120 = vmatprep.mubr.msk.bf16.mxu1 %vm3379_vm1, %v3378_v5 }
 0xba4   :  { %3130 = vmatprep.subr.bf16.mxu1 %v3378_v5 }
 0xba5   :  { %v1803_v54 = vpop.permute.xlu1 %1802  ;;  %v2021_v3 = vpop.permute.xlu0 %2020 }
 0xba6   :  { %v1808_v60 = vsel %vm225_vm10, %v1803_v54, 0  ;;  %v2026_v4 = vsel %vm225_vm10, %v2021_v3, 0 }
 0xba9   :  { %v1914_v55 = vpop.permute.xlu1 %1913  ;;  %v2132_v22 = vpop.permute.xlu0 %2131 }
 0xbaa   :  { %3121 = vmatmul.mubr.msk.bf16.vlgmr.msra.gmra.mxu1 %vm225_vm10, %v1579_v49  ;;  %v1919_v1 = vsel %vm225_vm10, %v1914_v55, 0  ;;  %v2137_v6 = vsel %vm225_vm10, %v2132_v22, 0  ;;  %v3374_v55 = vld [vmem:[%s4088_s1] sm:$0xff] }
 0xbab   :  { %3131 = vmatpush3.bf16.xpose.msra.mxu1 %v1697_v56  ;;  %3132 = vmatprep.mubr.msk.bf16.mxu1 %vm3379_vm1, %v3378_v5 }
 0xbac   :  { %3142 = vmatprep.subr.bf16.mxu1 %v3378_v5 }
 0xbad   :  { %v2019_v57 = vpop.permute.xlu1 %2018  ;;  %v2243_v7 = vpop.permute.xlu0 %2242 }
 0xbae   :  { %v2248_v24 = vsel %vm225_vm10, %v2243_v7, 0 }
 0xbb1   :  { %v2130_v59 = vpop.permute.xlu1 %2129 }
 0xbb2   :  { %3133 = vmatmul.mubr.msk.bf16.vlgmr.msra.gmra.mxu1 %vm225_vm10, %v1690_v58 }
 0xbb3   :  { %3143 = vmatpush3.bf16.xpose.msra.mxu1 %v1808_v60  ;;  %3144 = vmatprep.mubr.msk.bf16.mxu1 %vm3379_vm1, %v3378_v5 }
 0xbb4   :  { %3154 = vmatprep.subr.bf16.mxu1 %v3378_v5 }
 0xbb5   :  { %v2241_v61 = vpop.permute.xlu1 %2240 }
 0xbb9   :  { %v1530_v0 = vpop.permute.xlu1 %1529 }
 0xbba   :  { %v1535_v2 = vsel %vm98_vm0, %v1530_v0, 0  ;;  %3145 = vmatmul.mubr.msk.bf16.vlgmr.msra.gmra.mxu1 %vm225_vm10, %v1801_v62 }
 0xbbb   :  { %3113 = vmatpush3.bf16.msra.mxu0 %v1535_v2  ;;  %3155 = vmatpush3.bf16.xpose.msra.mxu1 %v1919_v1 }
 0xbbc   :  { %3156 = vmatprep.mubr.msk.bf16.mxu1 %vm3379_vm1, %v3378_v5  ;;  %3166 = vmatprep.subr.bf16.mxu1 %v3378_v5 }
 0xbbd   :  { %3124 = vmatprep.subr.bf16.mxu0 %v3378_v5 }
 0xbc2   :  { %3157 = vmatmul.mubr.msk.bf16.vlgmr.msra.gmra.mxu1 %vm225_vm10, %v3821_v46 }
 0xbc3   :  { %3167 = vmatpush3.bf16.xpose.msra.mxu1 %v2026_v4  ;;  %3168 = vmatprep.mubr.msk.bf16.mxu1 %vm3379_vm1, %v3378_v5 }
 0xbc4   :  { %3178 = vmatprep.subr.bf16.mxu1 %v3378_v5 }
 0xbca   :  { %3169 = vmatmul.mubr.msk.bf16.vlgmr.msra.gmra.mxu1 %vm225_vm10, %v2019_v57 }
 0xbcb   :  { %3179 = vmatpush3.bf16.xpose.msra.mxu1 %v2137_v6  ;;  %3180 = vmatprep.mubr.msk.bf16.mxu1 %vm3379_vm1, %v3378_v5 }
 0xbcc   :  { %3190 = vmatprep.subr.bf16.mxu1 %v3378_v5 }
 0xbd2   :  { %3181 = vmatmul.mubr.msk.bf16.vlgmr.msra.gmra.mxu1 %vm225_vm10, %v2130_v59 }
 0xbd3   :  { %3191 = vmatpush3.bf16.xpose.msra.mxu1 %v2248_v24  ;;  %3192 = vmatprep.mubr.msk.bf16.mxu1 %vm3379_vm1, %v3378_v5 }
 0xbd4   :  { %3202 = vmatprep.subr.bf16.mxu1 %v3378_v5 }
 0xbda   :  { %3193 = vmatmul.mubr.msk.bf16.vlgmr.msra.gmra.mxu1 %vm225_vm10, %v2241_v61 }
 0xbdb   :  { %3206 = vmatprep.mubr.msk.bf16.mxu1 %vm3379_vm1, %v3378_v5 }
 0xc62   :  { %v1515_v8 = vpop.f32.mrf.mxu1 }
 0xc63   :  { %v1516_v9 = vadd.f32 %v1515_v8, %v3592_v63 }
 0xc64   :  { %v3110_v10 = vpop.f32.mrf.mxu1 }
 0xc65   :  { %v1521_v11 = vmul.f32 1.442695, %v1516_v9  ;;  %v3375_v9 = vld [vmem:[%s4088_s1 + $0x8] sm:$0xff] }
 0xc66   :  { %v1518_v12 = vpop.f32.mrf.mxu1 }
 0xc67   :  { %3334 = vpow2.f32 %v1521_v11 }
 0xc68   :  { %v3111_v13 = vpop.f32.mrf.mxu1 }
 0xc6a   :  { %v1622_v14 = vpop.f32.mrf.mxu1 }
 0xc6b   :  { %v1623_v15 = vadd.f32 %v1622_v14, %v3592_v63 }
 0xc6c   :  { %v3122_v38 = vpop.f32.mrf.mxu1 }
 0xc6d   :  { %v1628_v19 = vmul.f32 1.442695, %v1623_v15 }
 0xc6e   :  { %v1625_v23 = vpop.f32.mrf.mxu1 }
 0xc6f   :  { %3336 = vpow2.f32 %v1628_v19 }
 0xc70   :  { %v3123_v25 = vpop.f32.mrf.mxu1 }
 0xc72   :  { %v1733_v26 = vpop.f32.mrf.mxu1 }
 0xc73   :  { %v1734_v56 = vadd.f32 %v3374_v55, %v1733_v26 }
 0xc74   :  { %v3889_v30 = vpop.eup %3334  ;;  %v3134_v20 = vpop.f32.mrf.mxu1 }
 0xc75   :  { %v1523_v31 = vsel %vm225_vm10, %v3889_v30, 0.0  ;;  %v1739_v59 = vmul.f32 1.442695, %v1734_v56 }
 0xc76   :  { %1524 = vadd.xlane.f32.xlu0 %v1523_v31  ;;  %v1736_v35 = vpop.f32.mrf.mxu1 }
 0xc77   :  { %3338 = vpow2.f32 %v1739_v59  ;;  %v1637_v35 = vpop.permute.xlu0 %1636 }
 0xc78   :  { %v3135_v29 = vpop.f32.mrf.mxu1 }
 0xc7a   :  { %v1844_v39 = vpop.f32.mrf.mxu1 }
 0xc7b   :  { %v1845_v60 = vadd.f32 %v3374_v55, %v1844_v39 }
 0xc7c   :  { %v3893_v40 = vpop.eup %3336  ;;  %v3146_v41 = vpop.f32.mrf.mxu1 }
 0xc7d   :  { %v1630_v63 = vsel %vm225_vm10, %v3893_v40, 0.0  ;;  %v1850_v1 = vmul.f32 1.442695, %v1845_v60 }
 0xc7e   :  { %1631 = vadd.xlane.f32.xlu1 %v1630_v63  ;;  %v1847_v43 = vpop.f32.mrf.mxu1 }
 0xc7f   :  { %3340 = vpow2.f32 %v1850_v1 }
 0xc80   :  { %v3147_v44 = vpop.f32.mrf.mxu1 }
 0xc81   :  { %v1642_v44 = vsel %vm98_vm0, %v1637_v35, 0 }
 0xc82   :  { %v1955_v28 = vpop.f32.mrf.mxu1 }
 0xc83   :  { %v1956_v0 = vadd.f32 %v3612_v45, %v1955_v28 }
 0xc84   :  { %v3158_v47 = vpop.f32.mrf.mxu1  ;;  %v3339_v12 = vpop.eup %3338 }
 0xc85   :  { %v1961_v4 = vmul.f32 1.442695, %v1956_v0  ;;  %v1741_v13 = vsel %vm225_vm10, %v3339_v12, 0.0 }
 0xc86   :  { %v1958_v48 = vpop.f32.mrf.mxu1 }
 0xc87   :  { %3342 = vpow2.f32 %v1961_v4 }
 0xc88   :  { %v3159_v49 = vpop.f32.mrf.mxu1 }
 0xc8a   :  { %v2062_v52 = vpop.f32.mrf.mxu1 }
 0xc8b   :  { %v2063_v2 = vadd.f32 %v3612_v45, %v2062_v52 }
 0xc8c   :  { %1747 = vrot.lane.b32.xlu0 %v3807_v42, %s3390_s17  ;;  %v3170_v34 = vpop.f32.mrf.mxu1  ;;  %v3341_v14 = vpop.eup %3340 }
 0xc8d   :  { %v2068_v22 = vmul.f32 1.442695, %v2063_v2 }
 0xc8e   :  { %v2065_v53 = vpop.f32.mrf.mxu1 }
 0xc8f   :  { %1858 = vrot.lane.b32.xlu1 %v3807_v42, %s3389_s0  ;;  %3344 = vpow2.f32 %v2068_v22 }
 0xc90   :  { %v3171_v54 = vpop.f32.mrf.mxu1 }
 0xc92   :  { %v2173_v57 = vpop.f32.mrf.mxu1 }
 0xc93   :  { %v2174_v6 = vadd.f32 %v3612_v45, %v2173_v57  ;;  %v1852_v45 = vsel %vm225_vm10, %v3341_v14, 0.0 }
 0xc94   :  { %v3182_v58 = vpop.f32.mrf.mxu1  ;;  %v3911_v15 = vpop.eup %3342 }
 0xc95   :  { %v2179_v8 = vmul.f32 1.442695, %v2174_v6  ;;  %v1963_v19 = vsel %vm225_vm10, %v3911_v15, 0.0 }
 0xc96   :  { %v2176_v61 = vpop.f32.mrf.mxu1 }
 0xc97   :  { %3346 = vpow2.f32 %v2179_v8 }
 0xc98   :  { %v3183_v62 = vpop.f32.mrf.mxu1 }
 0xc9a   :  { %v2284_v3 = vpop.f32.mrf.mxu1 }
 0xc9b   :  { %v2285_v10 = vadd.f32 %v3375_v9, %v2284_v3 }
 0xc9c   :  { %v3194_v42 = vpop.f32.mrf.mxu1  ;;  %v3914_v38 = vpop.eup %3344 }
 0xc9d   :  { %v2290_v11 = vmul.f32 1.442695, %v2285_v10  ;;  %v2070_v23 = vsel %vm225_vm10, %v3914_v38, 0.0 }
 0xc9e   :  { %v2287_v7 = vpop.f32.mrf.mxu1 }
 0xc9f   :  { %3348 = vpow2.f32 %v2290_v11 }
 0xca0   :  { %v3195_v24 = vpop.f32.mrf.mxu1 }
 0xca4   :  { %v3920_v25 = vpop.eup %3346 }
 0xca5   :  { %v2181_v26 = vsel %vm225_vm10, %v3920_v25, 0.0 }
 0xcab   :  { %1742 = vadd.xlane.f32.xlu0 %v1741_v13 }
 0xcac   :  { %v3924_v20 = vpop.eup %3348 }
 0xcad   :  { %v2292_v31 = vsel %vm225_vm10, %v3924_v20, 0.0 }
 0xcaf   :  { %1853 = vadd.xlane.f32.xlu0 %v1852_v45 }
 0xcb3   :  { %1964 = vadd.xlane.f32.xlu0 %v1963_v19  ;;  %2071 = vadd.xlane.f32.xlu1 %v2070_v23 }
 0xcb7   :  { %2182 = vadd.xlane.f32.xlu0 %v2181_v26 }
 0xcbb   :  { %2293 = vadd.xlane.f32.xlu0 %v2292_v31 }
 0xcc4   :  { %2076 = vrot.lane.b32.xlu1 %v3821_v46, %s3387_s13 }
 0xcc8   :  { %2187 = vrot.lane.b32.xlu1 %v3821_v46, %s3390_s17 }
 0xccc   :  { %2298 = vrot.lane.b32.xlu1 %v3821_v46, %s3389_s0 }
 0xcd1   :  { %1969 = vrot.lane.b32.xlu0 %v3821_v46, %s3388_s14 }
 0xcff   :  { %v1525_v29 = vpop.xlane.xlu0 %1524 }
 0xd00   :  { %3350 = vrcp.f32 %v1525_v29 }
 0xd03   :  { %v1748_v47 = vpop.permute.xlu0 %1747 }
 0xd04   :  { %v1753_v49 = vsel %vm98_vm0, %v1748_v47, 0 }
 0xd07   :  { %v1632_v39 = vpop.xlane.xlu1 %1631 }
 0xd08   :  { %3352 = vrcp.f32 %v1632_v39 }
 0xd0b   :  { %v1859_v54 = vpop.permute.xlu1 %1858 }
 0xd0c   :  { %v1864_v60 = vsel %vm98_vm0, %v1859_v54, 0  ;;  %v3284_v54 = vld [vmem:[%s4089_s4 + $0x18] sm:$0xff]  }
 0xd0d   :  { %v3351_v41 = vpop.eup %3350  ;;  %3203 = vmatpush3.bf16.msra.mxu1 %v3284_v54 }
 0xd0e   :  { %v1527_v63 = vmul.f32 %v3351_v41, %v3889_v30  ;;  %3204 = vmatprep.subr.bf16.mxu1 %v3378_v5 }
 0xd10   :  { %v1528_v43 = vpack.c.bf16 %v1527_v63, %v1527_v63 }
 0xd12   :  { %3115 = vmatmul.mubr.msk.bf16.vlgmr.msra.gmra.mxu0 %vm225_vm10, %v1528_v43 }
 0xd13   :  { %3125 = vmatpush3.bf16.msra.mxu0 %v1642_v44  ;;  %3126 = vmatprep.mubr.msk.bf16.mxu0 %vm3379_vm1, %v3378_v5 }
 0xd14   :  { %3136 = vmatprep.subr.bf16.mxu0 %v3378_v5 }
 0xd15   :  { %v3353_v46 = vpop.eup %3352 }
 0xd16   :  { %v1634_v28 = vmul.f32 %v3353_v46, %v3893_v40 }
 0xd18   :  { %v1635_v48 = vpack.c.bf16 %v1634_v28, %v1634_v28 }
 0xd1a   :  { %3127 = vmatmul.mubr.msk.bf16.vlgmr.msra.gmra.mxu0 %vm225_vm10, %v1635_v48 }
 0xd1b   :  { %3137 = vmatpush3.bf16.msra.mxu0 %v1753_v49  ;;  %3138 = vmatprep.mubr.msk.bf16.mxu0 %vm3379_vm1, %v3378_v5 }
 0xd1c   :  { %3148 = vmatprep.subr.bf16.mxu0 %v3378_v5 }
 0xd34   :  { %v1743_v30 = vpop.xlane.xlu0 %1742 }
 0xd35   :  { %3354 = vrcp.f32 %v1743_v30 }
 0xd38   :  { %v1854_v52 = vpop.xlane.xlu0 %1853 }
 0xd39   :  { %3356 = vrcp.f32 %v1854_v52 }
 0xd3c   :  { %v1965_v34 = vpop.xlane.xlu0 %1964  ;;  %v2072_v58 = vpop.xlane.xlu1 %2071 }
 0xd3d   :  { %3358 = vrcp.f32 %v1965_v34 }
 0xd3e   :  { %3360 = vrcp.f32 %v2072_v58 }
 0xd40   :  { %v2183_v53 = vpop.xlane.xlu0 %2182  ;;  %v2077_v42 = vpop.permute.xlu1 %2076 }
 0xd41   :  { %3362 = vrcp.f32 %v2183_v53  ;;  %v2082_v6 = vsel %vm98_vm0, %v2077_v42, 0 }
 0xd42   :  { %v3355_v40 = vpop.eup %3354 }
 0xd43   :  { %v1745_v55 = vmul.f32 %v3355_v40, %v3339_v12 }
 0xd44   :  { %v2294_v59 = vpop.xlane.xlu0 %2293  ;;  %v2188_v24 = vpop.permute.xlu1 %2187 }
 0xd45   :  { %v1746_v56 = vpack.c.bf16 %v1745_v55, %v1745_v55  ;;  %3364 = vrcp.f32 %v2294_v59  ;;  %v2193_v10 = vsel %vm98_vm0, %v2188_v24, 0 }
 0xd46   :  { %v3357_v57 = vpop.eup %3356 }
 0xd47   :  { %3139 = vmatmul.mubr.msk.bf16.vlgmr.msra.gmra.mxu0 %vm225_vm10, %v1746_v56  ;;  %v1856_v61 = vmul.f32 %v3357_v57, %v3341_v14  ;;  %v3285_v56 = vld [vmem:[%s4089_s4 + $0x10] sm:$0xff]  }
 0xd48   :  { %3149 = vmatpush3.bf16.msra.mxu0 %v1864_v60  ;;  %3150 = vmatprep.mubr.msk.bf16.mxu0 %vm3379_vm1, %v3378_v5  ;;  %v1970_v62 = vpop.permute.xlu0 %1969  ;;  %v2299_v12 = vpop.permute.xlu1 %2298 }
 0xd49   :  { %3160 = vmatprep.subr.bf16.mxu0 %v3378_v5  ;;  %v1857_v0 = vpack.c.bf16 %v1856_v61, %v1856_v61  ;;  %v1975_v2 = vsel %vm98_vm0, %v1970_v62, 0  ;;  %3205 = vmatpush3.bf16.msra.mxu1 %v3285_v56 }
 0xd4a   :  { %v3359_v1 = vpop.eup %3358  ;;  %3218 = vmatprep.subr.bf16.mxu1 %v3378_v5 }
 0xd4b   :  { %v1967_v3 = vmul.f32 %v3359_v1, %v3911_v15  ;;  %v3361_v22 = vpop.eup %3360  ;;  %v2304_v15 = vsel %vm98_vm0, %v2299_v12, 0 }
 0xd4c   :  { %v2074_v7 = vmul.f32 %v3361_v22, %v3914_v38 }
 0xd4d   :  { %v1968_v4 = vpack.c.bf16 %v1967_v3, %v1967_v3 }
 0xd4e   :  { %v2075_v8 = vpack.c.bf16 %v2074_v7, %v2074_v7  ;;  %v3363_v9 = vpop.eup %3362 }
 0xd4f   :  { %3151 = vmatmul.mubr.msk.bf16.vlgmr.msra.gmra.mxu0 %vm225_vm10, %v1857_v0  ;;  %v2185_v11 = vmul.f32 %v3363_v9, %v3920_v25  ;;  %v2357_v9 = vrot.slane %v3802_v36, %v1110_v50 }
 0xd50   :  { %3161 = vmatpush3.bf16.msra.mxu0 %v1975_v2  ;;  %3162 = vmatprep.mubr.msk.bf16.mxu0 %vm3379_vm1, %v3378_v5 }
 0xd51   :  { %3172 = vmatprep.subr.bf16.mxu0 %v3378_v5  ;;  %v2186_v13 = vpack.c.bf16 %v2185_v11, %v2185_v11 }
 0xd52   :  { %v3365_v14 = vpop.eup %3364 }
 0xd53   :  { %v2296_v45 = vmul.f32 %v3365_v14, %v3924_v20 }
 0xd55   :  { %v2297_v38 = vpack.c.bf16 %v2296_v45, %v2296_v45 }
 0xd57   :  { %3163 = vmatmul.mubr.msk.bf16.vlgmr.msra.gmra.mxu0 %vm225_vm10, %v1968_v4 }
 0xd58   :  { %3173 = vmatpush3.bf16.msra.mxu0 %v2082_v6  ;;  %3174 = vmatprep.mubr.msk.bf16.mxu0 %vm3379_vm1, %v3378_v5 }
 0xd59   :  { %3184 = vmatprep.subr.bf16.mxu0 %v3378_v5 }
 0xd5f   :  { %3175 = vmatmul.mubr.msk.bf16.vlgmr.msra.gmra.mxu0 %vm225_vm10, %v2075_v8 }
 0xd60   :  { %3185 = vmatpush3.bf16.msra.mxu0 %v2193_v10  ;;  %3186 = vmatprep.mubr.msk.bf16.mxu0 %vm3379_vm1, %v3378_v5 }
 0xd61   :  { %3196 = vmatprep.subr.bf16.mxu0 %v3378_v5 }
 0xd67   :  { %3187 = vmatmul.mubr.msk.bf16.vlgmr.msra.gmra.mxu0 %vm225_vm10, %v2186_v13 }
 0xd68   :  { %3197 = vmatpush3.bf16.msra.mxu0 %v2304_v15  ;;  %3198 = vmatprep.mubr.msk.bf16.mxu0 %vm3379_vm1, %v3378_v5 }
 0xd69   :  { %3210 = vmatprep.subr.bf16.mxu0 %v3378_v5 }
 0xd6f   :  { %3199 = vmatmul.mubr.msk.bf16.vlgmr.msra.gmra.mxu0 %vm225_vm10, %v2297_v38 }
 0xd70   :  { %3214 = vmatprep.mubr.msk.bf16.mxu0 %vm3379_vm1, %v3378_v5 }
 0xdd2   :  { %v1571_v19 = vpop.f32.mrf.mxu0 }
 0xdd3   :  { %1577 = vst.msk [vmem:[#allocation2] sm:$0xff] %vm225_vm10, %v1571_v19 }
 0xdd4   :  { %v3116_v23 = vpop.f32.mrf.mxu0 }
 0xdd6   :  { %v1574_v25 = vpop.f32.mrf.mxu0 }
 0xdd8   :  { %v3117_v26 = vpop.f32.mrf.mxu0 }
 0xdda   :  { %v1678_v31 = vpop.f32.mrf.mxu0 }
 0xddb   :  { %1685 = vrot.lane.b32.xlu1 %v1678_v31, %s3391_s20 }
 0xddc   :  { %v3128_v35 = vpop.f32.mrf.mxu0 }
 0xdde   :  { %v1681_v29 = vpop.f32.mrf.mxu0 }
 0xde0   :  { %v3129_v20 = vpop.f32.mrf.mxu0 }
 0xe07   :  { %v1789_v39 = vpop.f32.mrf.mxu0 }
 0xe08   :  { %1796 = vrot.lane.b32.xlu0 %v1789_v39, %s3392_s21 }
 0xe09   :  { %v3140_v41 = vpop.f32.mrf.mxu0 }
 0xe0b   :  { %v1792_v63 = vpop.f32.mrf.mxu0 }
 0xe0c   :  { %v3287_v63 = vld [vmem:[%s4090_s5 + $0x10] sm:$0xff]  }
 0xe0d   :  { %v3141_v43 = vpop.f32.mrf.mxu0 }
 0xe0e   :  { %v3288_v43 = vld [vmem:[%s4091_s6 + $0x38] sm:$0xff]  }
 0xe0f   :  { %v1900_v44 = vpop.f32.mrf.mxu0 }
 0xe10   :  { %1907 = vrot.lane.b32.xlu0 %v1900_v44, %s3393_s2 }
 0xe11   :  { %v3152_v46 = vpop.f32.mrf.mxu0 }
 0xe13   :  { %v1903_v28 = vpop.f32.mrf.mxu0 }
 0xe15   :  { %v3153_v47 = vpop.f32.mrf.mxu0 }
 0xe17   :  { %v2011_v48 = vpop.f32.mrf.mxu0 }
 0xe18   :  { %2017 = vst.msk [vmem:[#allocation2 + $0x8] sm:$0xff] %vm225_vm10, %v2011_v48 }
 0xe19   :  { %v3164_v49 = vpop.f32.mrf.mxu0 }
 0xe1b   :  { %v2014_v30 = vpop.f32.mrf.mxu0 }
 0xe1d   :  { %v3165_v52 = vpop.f32.mrf.mxu0 }
 0xe1f   :  { %v2118_v34 = vpop.f32.mrf.mxu0 }
 0xe20   :  { %2125 = vrot.lane.b32.xlu1 %v2118_v34, %s3391_s20  ;;  %v2445_v34 = vrot.slane %v3802_v36, %v1199_v16  ;;  %v3289_v16 = vld [vmem:[%s4091_s6 + $0x30] sm:$0xff]  }
 0xe21   :  { %v3176_v53 = vpop.f32.mrf.mxu0 }
 0xe23   :  { %v2121_v40 = vpop.f32.mrf.mxu0 }
 0xe25   :  { %v3177_v55 = vpop.f32.mrf.mxu0 }
 0xe26   :  { %v2451_v55 = vrot.slane %v3802_v36, %v1205_v21  ;;  %v3290_v21 = vld [vmem:[%s4091_s6 + $0x28] sm:$0xff]  }
 0xe27   :  { %v2229_v57 = vpop.f32.mrf.mxu0 }
 0xe28   :  { %2236 = vrot.lane.b32.xlu1 %v2229_v57, %s3392_s21 }
 0xe29   :  { %v3188_v58 = vpop.f32.mrf.mxu0 }
 0xe2b   :  { %v2232_v59 = vpop.f32.mrf.mxu0 }
 0xe2d   :  { %v3189_v60 = vpop.f32.mrf.mxu0 }
 0xe2e   :  { %v3291_v60 = vld [vmem:[%s4091_s6 + $0x20] sm:$0xff]  }
 0xe2f   :  { %v2340_v61 = vpop.f32.mrf.mxu0 }
 0xe30   :  { %2347 = vrot.lane.b32.xlu1 %v2340_v61, %s3393_s2  ;;  %v2463_v61 = vrot.slane %v3802_v36, %v1216_v37 }
 0xe31   :  { %v3200_v62 = vpop.f32.mrf.mxu0 }
 0xe33   :  { %v2343_v0 = vpop.f32.mrf.mxu0 }
 0xe35   :  { %v3201_v1 = vpop.f32.mrf.mxu0 }
 0xe4d   :  { %v1686_v2 = vpop.permute.xlu1 %1685 }
 0xe4e   :  { %1688 = vst.msk [vmem:[#allocation2] sm:$0xff] %vm439_vm11, %v1686_v2 }
 0xe7a   :  { %v1797_v3 = vpop.permute.xlu0 %1796 }
 0xe7b   :  { %1799 = vst.msk [vmem:[#allocation2] sm:$0xff] %vm551_vm12, %v1797_v3 }
 0xe82   :  { %v1908_v42 = vpop.permute.xlu0 %1907 }
 0xe83   :  { %1910 = vst.msk [vmem:[#allocation2] sm:$0xff] %vm663_vm13, %v1908_v42 }
 0xe8a   :  { %v2351_v7 = vld [vmem:[#allocation2] sm:$0xff] }
 0xe92   :  { %v2126_v4 = vpop.permute.xlu1 %2125 }
 0xe93   :  { %2128 = vst.msk [vmem:[#allocation2 + $0x8] sm:$0xff] %vm439_vm11, %v2126_v4 }
 0xe9a   :  { %v2237_v22 = vpop.permute.xlu1 %2236 }
 0xe9b   :  { %2239 = vst.msk [vmem:[#allocation2 + $0x8] sm:$0xff] %vm551_vm12, %v2237_v22 }
 0xea2   :  { %v2348_v6 = vpop.permute.xlu1 %2347 }
 0xea3   :  { %2350 = vst.msk [vmem:[#allocation2 + $0x8] sm:$0xff] %vm663_vm13, %v2348_v6 }
 0xeaa   :  { %v2352_v24 = vld [vmem:[#allocation2 + $0x8] sm:$0xff] }
 0xeab   :  { %v2353_v8 = vpack.c.bf16 %v2352_v24, %v2351_v7  ;;  %v2535_v7 = vrot.slane %v3802_v36, %v1287_v51 }
 0xead   :  { %3207 = vmatmul.mubr.msk.bf16.vlgmr.msra.gmra.mxu1 %vm176_vm9, %v2353_v8 }
 0xeae   :  { %3226 = vmatprep.mubr.msk.bf16.mxu1 %vm3379_vm1, %v3378_v5  ;;  %3219 = vmatpush3.bf16.msra.mxu1 %v3288_v43 }
 0xeaf   :  { %3220 = vmatprep.subr.bf16.mxu1 %v3378_v5 }
 0xeb2   :  { %3221 = vmatpush3.bf16.msra.mxu1 %v3289_v16 }
 0xeb3   :  { %3222 = vmatprep.subr.bf16.mxu1 %v3378_v5 }
 0xeb6   :  { %3223 = vmatpush3.bf16.msra.mxu1 %v3290_v21 }
 0xeb7   :  { %3224 = vmatprep.subr.bf16.mxu1 %v3378_v5 }
 0xeba   :  { %3225 = vmatpush3.bf16.msra.mxu1 %v3291_v60 }
 0xf6d   :  { %v2407_v10 = vpop.f32.mrf.mxu1 }
 0xf6e   :  { %v2408_v11 = vadd.f32 %v2407_v10, %v2357_v9 }
 0xf6f   :  { %v3208_v12 = vpop.f32.mrf.mxu1 }
 0xf70   :  { %v2414_v13 = vadd.f32 %v2408_v11, %v3790_v32 }
 0xf71   :  { %v2410_v14 = vpop.f32.mrf.mxu1 }
 0xf72   :  { %v2411_v15 = vadd.f32 %v2410_v14, %v2357_v9  ;;  %v2416_v45 = vsel %vm176_vm9, %v2414_v13, 0.0 }
 0xf73   :  { %2417 = vadd.xlane.f32.xlu0 %v2416_v45  ;;  %v3209_v38 = vpop.f32.mrf.mxu1 }
 0xf74   :  { %v2415_v19 = vadd.f32 %v2411_v15, %v3792_v33  ;;  %v3286_v33 = vld [vmem:[%s4090_s5 + $0x18] sm:$0xff]  }
 0xf75   :  { %3211 = vmatpush3.bf16.msra.mxu0 %v3286_v33 }
 0xf76   :  { %v2419_v23 = vsel %vm176_vm9, %v2415_v19, 0.0  ;;  %3212 = vmatprep.subr.bf16.mxu0 %v3378_v5 }
 0xf77   :  { %2420 = vadd.xlane.f32.xlu1 %v2419_v23 }
 0xf79   :  { %3213 = vmatpush3.bf16.msra.mxu0 %v3287_v63 }
 0xf7a   :  { %3230 = vmatprep.subr.bf16.mxu0 %v3378_v5 }
 0xffc   :  { %v2418_v25 = vpop.xlane.xlu0 %2417 }
 0xffd   :  { %v2422_v26 = vmul.f32 0.03125, %v2418_v25 }
 0xfff   :  { %v2424_v31 = vsub.f32 %v2414_v13, %v2422_v26 }
0x1000   :  { %v2421_v50 = vpop.xlane.xlu1 %2420 }
0x1001   :  { %v2423_v35 = vmul.f32 0.03125, %v2421_v50  ;;  %v2426_v29 = vmul.f32 %v2424_v31, %v2424_v31 }
0x1003   :  { %v2425_v20 = vsub.f32 %v2415_v19, %v2423_v35  ;;  %v2428_v32 = vsel %vm176_vm9, %v2426_v29, 0.0  ;;  %v3292_v29 = vld [vmem:[%s4092_s8 + $0x8] sm:$0xff]  }
0x1004   :  { %2429 = vadd.xlane.f32.xlu0 %v2428_v32 }
0x1005   :  { %v2427_v39 = vmul.f32 %v2425_v20, %v2425_v20 }
0x1007   :  { %v2431_v41 = vsel %vm176_vm9, %v2427_v39, 0.0 }
0x1008   :  { %2432 = vadd.xlane.f32.xlu0 %v2431_v41 }
0x108d   :  { %v2430_v44 = vpop.xlane.xlu0 %2429 }
0x108e   :  { %v2434_v46 = vmul.f32 0.03125, %v2430_v44 }
0x1090   :  { %v2436_v28 = vadd.f32 1e-05, %v2434_v46 }
0x1091   :  { %v2433_v47 = vpop.xlane.xlu0 %2432 }
0x1092   :  { %3366 = vrsqrt.f32 %v2436_v28  ;;  %v2435_v48 = vmul.f32 0.03125, %v2433_v47  ;;  %v2635_v28 = vrot.slane %v3802_v36, %v1388_v17 }
0x1094   :  { %v2437_v49 = vadd.f32 1e-05, %v2435_v48 }
0x1096   :  { %3368 = vrsqrt.f32 %v2437_v49 }
0x109f   :  { %v3367_v30 = vpop.eup %3366 }
0x10a0   :  { %v2440_v52 = vmul.f32 %v3367_v30, %v2424_v31  ;;  %v2641_v30 = vrot.slane %v3802_v36, %v1394_v18 }
0x10a2   :  { %v2446_v54 = vmul.f32 %v2445_v34, %v2440_v52 }
0x10a3   :  { %v3369_v53 = vpop.eup %3368 }
0x10a4   :  { %v2441_v40 = vmul.f32 %v3369_v53, %v2425_v20  ;;  %v2452_v57 = vadd.f32 %v2451_v55, %v2446_v54  ;;  %v3293_v20 = vld [vmem:[%s4092_s8] sm:$0xff]  }
0x10a6   :  { %v2447_v56 = vmul.f32 %v2445_v34, %v2441_v40 }
0x10a8   :  { %v2453_v58 = vadd.f32 %v2451_v55, %v2447_v56 }
0x10aa   :  { %v2454_v59 = vpack.c.bf16 %v2453_v58, %v2452_v57 }
0x10ac   :  { %3215 = vmatmul.mubr.msk.bf16.vlgmr.msra.gmra.mxu0 %vm176_vm9, %v2454_v59 }
0x10ad   :  { %3234 = vmatprep.mubr.msk.bf16.mxu0 %vm3379_vm1, %v3378_v5  ;;  %3231 = vmatpush3.bf16.msra.mxu0 %v3292_v29 }
0x10ae   :  { %3232 = vmatprep.subr.bf16.mxu0 %v3378_v5 }
0x10b1   :  { %3233 = vmatpush3.bf16.msra.mxu0 %v3293_v20 }
0x10b2   :  { %3238 = vmatprep.subr.bf16.mxu0 %v3378_v5 }
0x116c   :  { %v2513_v62 = vpop.f32.mrf.mxu0 }
0x116d   :  { %v2514_v1 = vadd.f32 %v2513_v62, %v2463_v61 }
0x116e   :  { %v3216_v0 = vpop.f32.mrf.mxu0 }
0x116f   :  { %v2520_v4 = vmax.f32 %v2514_v1, 0.0 }
0x1170   :  { %v2516_v2 = vpop.f32.mrf.mxu0 }
0x1171   :  { %v2517_v3 = vadd.f32 %v2516_v2, %v2463_v61 }
0x1172   :  { %v3217_v42 = vpop.f32.mrf.mxu0 }
0x1173   :  { %v2521_v22 = vmax.f32 %v2517_v3, 0.0 }
0x1175   :  { %v2522_v6 = vpack.c.bf16 %v2521_v22, %v2520_v4 }
0x1177   :  { %3227 = vmatmul.mubr.msk.bf16.vlgmr.msra.gmra.mxu1 %vm1313_vm14, %v2522_v6 }
0x1237   :  { %v2597_v24 = vpop.f32.mrf.mxu1 }
0x1238   :  { %v2598_v8 = vadd.f32 %v2597_v24, %v2535_v7 }
0x1239   :  { %v3228_v9 = vpop.f32.mrf.mxu1 }
0x123a   :  { %v2604_v10 = vadd.f32 %v2598_v8, %v2452_v57 }
0x123b   :  { %v2600_v37 = vpop.f32.mrf.mxu1 }
0x123c   :  { %v2601_v11 = vadd.f32 %v2600_v37, %v2535_v7  ;;  %v2606_v12 = vsel %vm176_vm9, %v2604_v10, 0.0 }
0x123d   :  { %2607 = vadd.xlane.f32.xlu1 %v2606_v12  ;;  %v3229_v13 = vpop.f32.mrf.mxu1 }
0x123e   :  { %v2605_v14 = vadd.f32 %v2601_v11, %v2453_v58 }
0x1240   :  { %v2609_v15 = vsel %vm176_vm9, %v2605_v14, 0.0 }
0x1241   :  { %2610 = vadd.xlane.f32.xlu0 %v2609_v15 }
0x12c6   :  { %v2608_v45 = vpop.xlane.xlu1 %2607 }
0x12c7   :  { %v2612_v38 = vmul.f32 0.03125, %v2608_v45 }
0x12c9   :  { %v2614_v19 = vsub.f32 %v2604_v10, %v2612_v38 }
0x12ca   :  { %v2611_v23 = vpop.xlane.xlu0 %2610 }
0x12cb   :  { %v2613_v25 = vmul.f32 0.03125, %v2611_v23  ;;  %v2616_v51 = vmul.f32 %v2614_v19, %v2614_v19 }
0x12cd   :  { %v2615_v26 = vsub.f32 %v2605_v14, %v2613_v25  ;;  %v2618_v31 = vsel %vm176_vm9, %v2616_v51, 0.0 }
0x12ce   :  { %2619 = vadd.xlane.f32.xlu1 %v2618_v31 }
0x12cf   :  { %v2617_v50 = vmul.f32 %v2615_v26, %v2615_v26 }
0x12d1   :  { %v2621_v35 = vsel %vm176_vm9, %v2617_v50, 0.0 }
0x12d2   :  { %2622 = vadd.xlane.f32.xlu0 %v2621_v35 }
0x1357   :  { %v2620_v32 = vpop.xlane.xlu1 %2619 }
0x1358   :  { %v2624_v39 = vmul.f32 0.03125, %v2620_v32 }
0x135a   :  { %v2626_v41 = vadd.f32 1e-05, %v2624_v39 }
0x135b   :  { %v2623_v33 = vpop.xlane.xlu0 %2622 }
0x135c   :  { %3370 = vrsqrt.f32 %v2626_v41  ;;  %v2625_v63 = vmul.f32 0.03125, %v2623_v33 }
0x135e   :  { %v2627_v43 = vadd.f32 1e-05, %v2625_v63 }
0x1360   :  { %3372 = vrsqrt.f32 %v2627_v43 }
0x1369   :  { %v3371_v44 = vpop.eup %3370 }
0x136a   :  { %v2630_v46 = vmul.f32 %v3371_v44, %v2614_v19 }
0x136c   :  { %v2636_v49 = vmul.f32 %v2635_v28, %v2630_v46 }
0x136d   :  { %v3373_v47 = vpop.eup %3372 }
0x136e   :  { %v2631_v48 = vmul.f32 %v3373_v47, %v2615_v26  ;;  %v2642_v34 = vadd.f32 %v2641_v30, %v2636_v49 }
0x1370   :  { %v2637_v52 = vmul.f32 %v2635_v28, %v2631_v48 }
0x1372   :  { %v2643_v53 = vadd.f32 %v2641_v30, %v2637_v52 }
0x1374   :  { %v2644_v40 = vpack.c.bf16 %v2643_v53, %v2642_v34 }
0x1376   :  { %3235 = vmatmul.mubr.msk.bf16.vlgmr.msra.gmra.mxu0 %vm176_vm9, %v2644_v40  ;;  %v2702_v17 = vrot.slane %v2644_v40, 4 }
0x1377   :  { %3239 = vmatpush3.bf16.msra.mxu0 %v3292_v29  ;;  %3242 = vmatprep.mubr.msk.bf16.mxu0 %vm3379_vm1, %v3378_v5 }
0x1378   :  { %3240 = vmatprep.subr.bf16.mxu0 %v3378_v5 }
0x137b   :  { %3241 = vmatpush3.bf16.msra.mxu0 %v3293_v20 }
0x137e   :  { %3243 = vmatmul.mubr.msk.bf16.vlgmr.msra.gmra.mxu0 %vm176_vm9, %v2702_v17 }
0x1436   :  { %v2694_v54 = vpop.f32.mrf.mxu0 }
0x1437   :  { %2700 = vst.msk [vmem:[%s4093_s9] sm:$0xff] %vm1313_vm14, %v2694_v54 }
0x1438   :  { %v3236_v27 = vpop.f32.mrf.mxu0 }
0x143a   :  { %v2697_v18 = vpop.f32.mrf.mxu0 }
0x143c   :  { %v3237_v36 = vpop.f32.mrf.mxu0 }
0x143e   :  { %v2740_v55 = vpop.f32.mrf.mxu0 }
0x143f   :  { %2747 = vrot.lane.b32.xlu1 %v2740_v55, %s3388_s14 }
0x1440   :  { %v3244_v56 = vpop.f32.mrf.mxu0 }
0x1442   :  { %v2743_v57 = vpop.f32.mrf.mxu0 }
0x1444   :  { %v3245_v58 = vpop.f32.mrf.mxu0 }
0x14b1   :  { %v2748_v5 = vpop.permute.xlu1 %2747 }
0x14b2   :  { %2751 = vst.msk [vmem:[%s4093_s9] sm:$0xff] %vm2750_vm15, %v2748_v5 }

</bundles_post_ra>
